<compile_context>
chip_gen: v5e
topology: v5e:2x2
jax: 0.10.0
libtpu: 0.0.40
codegen_flags: <defaults>
</compile_context>

<pallas_src>
import functools

import jax
import jax.numpy as jnp
from jax.experimental import pallas as pl
from jax.experimental.pallas import tpu as pltpu

BN_EPS = 1e-5
TILE_E = 4096  # edge-axis tile (lane axis); per-step footprint ~1 MiB -> safe everywhere


def _round_up(x, m):
    return (x + m - 1) // m * m


def _cdiv(a, b):
    return -(-a // b)


def _mlp_feature_major(x_bf16, w0_ref, b0_ref, hidden_refs, w_out_ref, b_out_ref):
    """Feature-major MLP: activations are [features, tE]; bf16 MXU operands, f32 acc."""
    h = jnp.dot(w0_ref[...], x_bf16, preferred_element_type=jnp.float32) + b0_ref[...]
    h = jnp.maximum(h, 0.0)
    for i in range(len(hidden_refs) // 2):
        w_ref = hidden_refs[2 * i]
        b_ref = hidden_refs[2 * i + 1]
        h = jnp.dot(w_ref[...], h.astype(jnp.bfloat16),
                    preferred_element_type=jnp.float32) + b_ref[...]
        h = jnp.maximum(h, 0.0)
    y = jnp.dot(w_out_ref[...], h.astype(jnp.bfloat16),
                preferred_element_type=jnp.float32) + b_out_ref[...]
    return y  # f32 [de, tE]


def _make_mlp_stats_kernel(n_extra_hidden: int, tile_e: int, n_tiles: int, n_valid: int):
    """Pass 1: in-kernel concat + MLP, stage y, emit per-tile (sum, centered M2)."""
    n_w = 2 * n_extra_hidden
    tail = n_valid - (n_tiles - 1) * tile_e          # valid rows in last tile (static)
    has_tail = tail != tile_e

    def kernel(*refs):
        src_ref, dest_ref, edge_ref = refs[0], refs[1], refs[2]
        w0_ref, b0_ref = refs[3], refs[4]
        hidden_refs = refs[5:5 + n_w]
        w_out_ref, b_out_ref = refs[5 + n_w], refs[6 + n_w]
        y_ref, sum_ref, m2_ref = refs[7 + n_w], refs[8 + n_w], refs[9 + n_w]

        # concat the three feature blocks along the sublane axis (8-aligned f32 -> cheap)
        x = jnp.concatenate([src_ref[...], dest_ref[...], edge_ref[...]], axis=0)
        y = _mlp_feature_major(x.astype(jnp.bfloat16), w0_ref, b0_ref,
                               hidden_refs, w_out_ref, b_out_ref)
        y_ref[...] = y  # stage lane-dense MLP output (f32) for pass 2 -- no recompute

        def full_tile_stats():
            s = jnp.sum(y, axis=1, keepdims=True)                 # [de, 1]
            mu = s * (1.0 / tile_e)
            d = y - mu
            sum_ref[...] = s[None]
            m2_ref[...] = jnp.sum(d * d, axis=1, keepdims=True)[None]

        if has_tail:
            is_last = pl.program_id(0) == n_tiles - 1

            @pl.when(is_last)
            def _():
                lane = jax.lax.broadcasted_iota(jnp.int32, (1, tile_e), 1)
                m = (lane < tail).astype(jnp.float32)             # [1, tE] lane mask
                s = jnp.sum(y * m, axis=1, keepdims=True)
                mu = s * (1.0 / tail)
                d = (y - mu) * m
                sum_ref[...] = s[None]
                m2_ref[...] = jnp.sum(d * d, axis=1, keepdims=True)[None]

            @pl.when(jnp.logical_not(is_last))
            def _():
                full_tile_stats()
        else:
            full_tile_stats()

    return kernel


def _bn_residual_kernel(y_ref, edge_ref, scale_ref, shift_ref, out_ref):
    """Pass 2: pure elementwise, fully lane-dense. scale/shift broadcast along lanes."""
    out_ref[...] = y_ref[...] * scale_ref[...] + shift_ref[...] + edge_ref[...]


def init_params(key, in_dim_node, in_dim_edge, hidden_dim, hidden_layers):
    """PyTorch-Linear-style init. Weights stored [in, out], biases [1, out]."""
    params = {}

    def linear(k, fan_in, fan_out):
        kw, kb = jax.random.split(k)
        bound = 1.0 / jnp.sqrt(float(fan_in))
        w = jax.random.uniform(kw, (fan_in, fan_out), jnp.float32, -bound, bound)
        b = jax.random.uniform(kb, (1, fan_out), jnp.float32, -bound, bound)
        return w, b

    keys = jax.random.split(key, hidden_layers + 1)
    in_dim = 2 * in_dim_node + in_dim_edge
    params["w0"], params["b0"] = linear(keys[0], in_dim, hidden_dim)
    params["hidden"] = []
    for i in range(hidden_layers - 1):
        params["hidden"].append(linear(keys[1 + i], hidden_dim, hidden_dim))
    params["w_out"], params["b_out"] = linear(keys[hidden_layers], hidden_dim, in_dim_edge)
    params["gamma"] = jnp.ones((1, in_dim_edge), jnp.float32)
    params["beta"] = jnp.zeros((1, in_dim_edge), jnp.float32)
    return params


@functools.partial(jax.jit, static_argnames=("hidden_layers",))
def edge_processor_forward(src, dest, edge_attr, u, batch, params, hidden_layers):
    """Pallas-backed forward. `u` and `batch` accepted for signature parity (unused)."""
    del u, batch
    E, de = edge_attr.shape
    dn = src.shape[1]
    k0 = 2 * dn + de
    hdim = params["b0"].shape[-1]
    n_extra = hidden_layers - 1

    # --- edge-axis tiling (lane axis, multiple of 256); prefer an even tile count so
    # --- the "parallel" axis balances across v7x's two TensorCores. Padding is confined
    # --- to the last tile by re-deriving n_tiles from the final tE.
    n_tiles = _cdiv(E, TILE_E)
    if 1 < n_tiles <= 8 and n_tiles % 2 == 1:
        n_tiles += 1
    tE = 256 * _cdiv(E, 256 * n_tiles)
    n_tiles = _cdiv(E, tE)
    E_pad = n_tiles * tE

    # --- layout plumbing: feature-major (transposed) f32 inputs, edge axis on lanes ---
    def to_fm(a):
        aT = a.astype(jnp.float32).T
        if E_pad != E:
            aT = jnp.pad(aT, ((0, 0), (0, E_pad - E)))
        return aT

    srcT, destT, edgeT = to_fm(src), to_fm(dest), to_fm(edge_attr)

    # feature-major weights: W^T [out, in] as bf16 MXU operands; biases [out, 1] f32
    weight_args = [params["w0"].T.astype(jnp.bfloat16),
                   params["b0"].reshape(-1, 1).astype(jnp.float32)]
    for (w, b) in params["hidden"]:
        weight_args += [w.T.astype(jnp.bfloat16), b.reshape(-1, 1).astype(jnp.float32)]
    weight_args += [params["w_out"].T.astype(jnp.bfloat16),
                    params["b_out"].reshape(-1, 1).astype(jnp.float32)]

    def const_spec(arr):
        # full-array block, constant index_map -> DMA'd once, VMEM-resident across steps
        return pl.BlockSpec(arr.shape, lambda i: (0,) * arr.ndim)

    def feat_spec(rows):
        return pl.BlockSpec((rows, tE), lambda i: (0, i))

    weight_specs = [const_spec(a) for a in weight_args]
    stat_spec = pl.BlockSpec((1, de, 1), lambda i: (i, 0, 0))

    mlp_flops = 2 * E_pad * (k0 * hdim + n_extra * hdim * hdim + hdim * de)
    weight_bytes = sum(a.size * a.dtype.itemsize for a in weight_args)
    cparams = pltpu.CompilerParams(
        dimension_semantics=("parallel",),          # edge axis splits across v7x cores
        vmem_limit_bytes=32 * 1024 * 1024)

    # ---------------- pass 1: MLP + staged y + per-tile BN partials ----------------
    cost1 = pl.CostEstimate(
        flops=mlp_flops + 6 * E_pad * de, transcendentals=0,
        bytes_accessed=((srcT.size + destT.size + edgeT.size) * 4 + weight_bytes
                        + E_pad * de * 4 + 2 * n_tiles * de * 4))
    y_fm, part_sum, part_m2 = pl.pallas_call(
        _make_mlp_stats_kernel(n_extra, tE, n_tiles, E),
        out_shape=(jax.ShapeDtypeStruct((de, E_pad), jnp.float32),
                   jax.ShapeDtypeStruct((n_tiles, de, 1), jnp.float32),
                   jax.ShapeDtypeStruct((n_tiles, de, 1), jnp.float32)),
        grid=(n_tiles,),
        in_specs=[feat_spec(dn), feat_spec(dn), feat_spec(de)] + weight_specs,
        out_specs=(feat_spec(de), stat_spec, stat_spec),
        compiler_params=cparams,
        cost_estimate=cost1,
    )(srcT, destT, edgeT, *weight_args)

    # ---------- tiny f32 finalize: exact Chan-style combine of per-tile stats ----------
    counts = jnp.asarray([float(tE)] * (n_tiles - 1) + [float(E - (n_tiles - 1) * tE)],
                         dtype=jnp.float32)                                  # [nT]
    s_t = part_sum[:, :, 0]                                                  # [nT, de]
    mean_t = s_t / counts[:, None]
    mean = jnp.sum(s_t, axis=0) / E                                          # [de]
    m2 = (jnp.sum(part_m2[:, :, 0], axis=0)
          + jnp.sum(counts[:, None] * (mean_t - mean[None, :]) ** 2, axis=0))
    var = m2 / E                                                             # biased var
    inv = jax.lax.rsqrt(var + BN_EPS)
    gamma = params["gamma"].reshape(-1)
    beta = params["beta"].reshape(-1)
    scale = (gamma * inv).reshape(de, 1).astype(jnp.float32)
    shift = (beta - mean * gamma * inv).reshape(de, 1).astype(jnp.float32)

    # ---------------- pass 2: elementwise fused BN + residual (lane-dense) ----------------
    cost2 = pl.CostEstimate(
        flops=3 * E_pad * de, transcendentals=0,
        bytes_accessed=3 * E_pad * de * 4 + 2 * de * 4)
    out_fm = pl.pallas_call(
        _bn_residual_kernel,
        out_shape=jax.ShapeDtypeStruct((de, E_pad), jnp.float32),
        grid=(n_tiles,),
        in_specs=[feat_spec(de), feat_spec(de), const_spec(scale), const_spec(shift)],
        out_specs=feat_spec(de),
        compiler_params=cparams,
        cost_estimate=cost2,
    )(y_fm, edgeT, scale, shift)

    return out_fm.T[:E]


def reference_forward(src, dest, edge_attr, params, hidden_layers):
    """Pure-JAX reference mirroring the module (same bf16 MXU-operand precision)."""
    x = jnp.concatenate([src, dest, edge_attr], -1).astype(jnp.bfloat16)
    h = jnp.dot(x, params["w0"].astype(jnp.bfloat16),
                preferred_element_type=jnp.float32) + params["b0"]
    h = jnp.maximum(h, 0.0)
    for (w, b) in params["hidden"]:
        h = jnp.dot(h.astype(jnp.bfloat16), w.astype(jnp.bfloat16),
                    preferred_element_type=jnp.float32) + b
        h = jnp.maximum(h, 0.0)
    y = jnp.dot(h.astype(jnp.bfloat16), params["w_out"].astype(jnp.bfloat16),
                preferred_element_type=jnp.float32) + params["b_out"]
    mean = jnp.mean(y, axis=0, keepdims=True)
    var = jnp.mean((y - mean) ** 2, axis=0, keepdims=True)
    y = (y - mean) / jnp.sqrt(var + BN_EPS)
    y = y * params["gamma"] + params["beta"]
    return y + edge_attr


if __name__ == "__main__":
    # Small, module-consistent shapes: multiple edge tiles + a ragged tail to exercise
    # the cross-tile BatchNorm combine and the last-tile lane masking.
    E = 5000
    in_dim_node = 8
    in_dim_edge = 8
    hidden_dim = 32
    hidden_layers = 2    # -> Linear(24,32), ReLU, Linear(32,32), ReLU, Linear(32,8)

    key = jax.random.PRNGKey(0)
    k_src, k_dest, k_edge, k_params = jax.random.split(key, 4)

    src = jax.random.normal(k_src, (E, in_dim_node), jnp.float32)
    dest = jax.random.normal(k_dest, (E, in_dim_node), jnp.float32)
    edge_attr = jax.random.normal(k_edge, (E, in_dim_edge), jnp.float32)
    u = jnp.zeros((1, 4), jnp.float32)          # unused by forward (parity only)
    batch = jnp.zeros((E,), jnp.int32)          # unused by forward (parity only)

    params = init_params(k_params, in_dim_node, in_dim_edge, hidden_dim, hidden_layers)

    out = edge_processor_forward(src, dest, edge_attr, u, batch, params, hidden_layers)
    out = jax.block_until_ready(out)

    ref = reference_forward(src, dest, edge_attr, params, hidden_layers)
    assert out.shape == (E, in_dim_edge)
    assert jnp.allclose(out, ref, atol=2e-3, rtol=2e-3), float(jnp.max(jnp.abs(out - ref)))

    print("KERNEL_OK")
</pallas_src>

<mosaic_0001>
module attributes {stable_mosaic.version = 11 : i64} {
  func.func @_bn_residual_kernel(%arg0: i32, %arg1: memref<8x2560xf32, #tpu.memory_space<vmem>>, %arg2: memref<8x2560xf32, #tpu.memory_space<vmem>>, %arg3: memref<8x1xf32, #tpu.memory_space<vmem>>, %arg4: memref<8x1xf32, #tpu.memory_space<vmem>>, %arg5: memref<8x2560xf32, #tpu.memory_space<vmem>>) attributes {dimension_semantics = [#tpu.dimension_semantics<parallel>], iteration_bounds = array<i64: 2>, scalar_prefetch = 0 : i64, scratch_operands = 0 : i64, tpu.core_type = #tpu.core_type<tc>, window_params = [{transform_indices = @transform_0, window_bounds = array<i64: 8, 2560>}, {transform_indices = @transform_1, window_bounds = array<i64: 8, 2560>}, {pipeline_mode = #tpu.pipeline_mode<synchronous>, transform_indices = @transform_2, window_bounds = array<i64: 8, 1>}, {pipeline_mode = #tpu.pipeline_mode<synchronous>, transform_indices = @transform_3, window_bounds = array<i64: 8, 1>}, {transform_indices = @transform_4, window_bounds = array<i64: 8, 2560>}]} {
    %c0 = arith.constant 0 : index
    %c0_0 = arith.constant 0 : index
    %0 = vector.load %arg1[%c0, %c0_0] : memref<8x2560xf32, #tpu.memory_space<vmem>>, vector<8x2560xf32>
    %c0_1 = arith.constant 0 : index
    %c0_2 = arith.constant 0 : index
    %1 = vector.load %arg3[%c0_1, %c0_2] : memref<8x1xf32, #tpu.memory_space<vmem>>, vector<8x1xf32>
    %2 = vector.broadcast %1 : vector<8x1xf32> to vector<8x2560xf32>
    %3 = arith.mulf %0, %2 : vector<8x2560xf32>
    %c0_3 = arith.constant 0 : index
    %c0_4 = arith.constant 0 : index
    %4 = vector.load %arg4[%c0_3, %c0_4] : memref<8x1xf32, #tpu.memory_space<vmem>>, vector<8x1xf32>
    %5 = vector.broadcast %4 : vector<8x1xf32> to vector<8x2560xf32>
    %6 = arith.addf %3, %5 : vector<8x2560xf32>
    %c0_5 = arith.constant 0 : index
    %c0_6 = arith.constant 0 : index
    %7 = vector.load %arg2[%c0_5, %c0_6] : memref<8x2560xf32, #tpu.memory_space<vmem>>, vector<8x2560xf32>
    %8 = arith.addf %6, %7 : vector<8x2560xf32>
    %c0_7 = arith.constant 0 : index
    %c0_8 = arith.constant 0 : index
    %9 = vector.load %arg5[%c0_7, %c0_8] : memref<8x2560xf32, #tpu.memory_space<vmem>>, vector<8x2560xf32>
    tpu.vector_store %arg5[%c0_7, %c0_8], %8 {strides = array<i32>} : memref<8x2560xf32, #tpu.memory_space<vmem>>, vector<8x2560xf32>,
    return
  }
  func.func @transform_0(%arg0: i32) -> (i32, i32) {
    %c0_i32 = arith.constant 0 : i32
    %c0_i32_0 = arith.constant 0 : i32
    return %c0_i32, %arg0 : i32, i32
  }
  func.func @transform_1(%arg0: i32) -> (i32, i32) {
    %c0_i32 = arith.constant 0 : i32
    %c0_i32_0 = arith.constant 0 : i32
    return %c0_i32, %arg0 : i32, i32
  }
  func.func @transform_2(%arg0: i32) -> (i32, i32) {
    %c0_i32 = arith.constant 0 : i32
    %c0_i32_0 = arith.constant 0 : i32
    %c0_i32_1 = arith.constant 0 : i32
    return %c0_i32, %c0_i32_0 : i32, i32
  }
  func.func @transform_3(%arg0: i32) -> (i32, i32) {
    %c0_i32 = arith.constant 0 : i32
    %c0_i32_0 = arith.constant 0 : i32
    %c0_i32_1 = arith.constant 0 : i32
    return %c0_i32, %c0_i32_0 : i32, i32
  }
  func.func @transform_4(%arg0: i32) -> (i32, i32) {
    %c0_i32 = arith.constant 0 : i32
    %c0_i32_0 = arith.constant 0 : i32
    return %c0_i32, %arg0 : i32, i32
  }
}

module attributes {stable_mosaic.version = 11 : i64} {
  func.func @kernel(%arg0: i32, %arg1: memref<8x2560xf32, #tpu.memory_space<vmem>>, %arg2: memref<8x2560xf32, #tpu.memory_space<vmem>>, %arg3: memref<8x2560xf32, #tpu.memory_space<vmem>>, %arg4: memref<32x24xbf16, #tpu.memory_space<vmem>>, %arg5: memref<32x1xf32, #tpu.memory_space<vmem>>, %arg6: memref<32x32xbf16, #tpu.memory_space<vmem>>, %arg7: memref<32x1xf32, #tpu.memory_space<vmem>>, %arg8: memref<8x32xbf16, #tpu.memory_space<vmem>>, %arg9: memref<8x1xf32, #tpu.memory_space<vmem>>, %arg10: memref<8x2560xf32, #tpu.memory_space<vmem>>, %arg11: memref<1x8x1xf32, #tpu.memory_space<vmem>>, %arg12: memref<1x8x1xf32, #tpu.memory_space<vmem>>) attributes {dimension_semantics = [#tpu.dimension_semantics<parallel>], iteration_bounds = array<i64: 2>, scalar_prefetch = 0 : i64, scratch_operands = 0 : i64, tpu.core_type = #tpu.core_type<tc>, window_params = [{transform_indices = @transform_0, window_bounds = array<i64: 8, 2560>}, {transform_indices = @transform_1, window_bounds = array<i64: 8, 2560>}, {transform_indices = @transform_2, window_bounds = array<i64: 8, 2560>}, {pipeline_mode = #tpu.pipeline_mode<synchronous>, transform_indices = @transform_3, window_bounds = array<i64: 32, 24>}, {pipeline_mode = #tpu.pipeline_mode<synchronous>, transform_indices = @transform_4, window_bounds = array<i64: 32, 1>}, {pipeline_mode = #tpu.pipeline_mode<synchronous>, transform_indices = @transform_5, window_bounds = array<i64: 32, 32>}, {pipeline_mode = #tpu.pipeline_mode<synchronous>, transform_indices = @transform_6, window_bounds = array<i64: 32, 1>}, {pipeline_mode = #tpu.pipeline_mode<synchronous>, transform_indices = @transform_7, window_bounds = array<i64: 8, 32>}, {pipeline_mode = #tpu.pipeline_mode<synchronous>, transform_indices = @transform_8, window_bounds = array<i64: 8, 1>}, {transform_indices = @transform_9, window_bounds = array<i64: 8, 2560>}, {transform_indices = @transform_10, window_bounds = array<i64: 1, 8, 1>}, {transform_indices = @transform_11, window_bounds = array<i64: 1, 8, 1>}]} {
    %c0 = arith.constant 0 : index
    %c0_0 = arith.constant 0 : index
    %0 = vector.load %arg1[%c0, %c0_0] : memref<8x2560xf32, #tpu.memory_space<vmem>>, vector<8x2560xf32>
    %c0_1 = arith.constant 0 : index
    %c0_2 = arith.constant 0 : index
    %1 = vector.load %arg2[%c0_1, %c0_2] : memref<8x2560xf32, #tpu.memory_space<vmem>>, vector<8x2560xf32>
    %c0_3 = arith.constant 0 : index
    %c0_4 = arith.constant 0 : index
    %2 = vector.load %arg3[%c0_3, %c0_4] : memref<8x2560xf32, #tpu.memory_space<vmem>>, vector<8x2560xf32>
    %3 = tpu.concatenate %0, %1, %2 in 0 : vector<8x2560xf32>, vector<8x2560xf32>, vector<8x2560xf32> -> vector<24x2560xf32>
    %4 = arith.truncf %3 : vector<24x2560xf32> to vector<24x2560xbf16>
    %c0_5 = arith.constant 0 : index
    %c0_6 = arith.constant 0 : index
    %5 = vector.load %arg4[%c0_5, %c0_6] : memref<32x24xbf16, #tpu.memory_space<vmem>>, vector<32x24xbf16>
    %cst = arith.constant dense<0.000000e+00> : vector<32x2560xf32>
    %6 = tpu.matmul %5, %4, %cst {dimension_numbers = #tpu.dot_dimension_numbers<[1], [0], [0], [1], [0, 0, 1, 1], [], []>} : vector<32x24xbf16>, vector<24x2560xbf16>, vector<32x2560xf32> -> vector<32x2560xf32>
    %c0_7 = arith.constant 0 : index
    %c0_8 = arith.constant 0 : index
    %7 = vector.load %arg5[%c0_7, %c0_8] : memref<32x1xf32, #tpu.memory_space<vmem>>, vector<32x1xf32>
    %8 = vector.broadcast %7 : vector<32x1xf32> to vector<32x2560xf32>
    %9 = arith.addf %6, %8 : vector<32x2560xf32>
    %cst_9 = arith.constant 0.000000e+00 : f32
    %10 = vector.broadcast %cst_9 : f32 to vector<32x2560xf32>
    %11 = arith.maximumf %9, %10 : vector<32x2560xf32>
    %c0_10 = arith.constant 0 : index
    %c0_11 = arith.constant 0 : index
    %12 = vector.load %arg6[%c0_10, %c0_11] : memref<32x32xbf16, #tpu.memory_space<vmem>>, vector<32x32xbf16>
    %13 = arith.truncf %11 : vector<32x2560xf32> to vector<32x2560xbf16>
    %cst_12 = arith.constant dense<0.000000e+00> : vector<32x2560xf32>
    %14 = tpu.matmul %12, %13, %cst_12 {dimension_numbers = #tpu.dot_dimension_numbers<[1], [0], [0], [1], [0, 0, 1, 1], [], []>} : vector<32x32xbf16>, vector<32x2560xbf16>, vector<32x2560xf32> -> vector<32x2560xf32>
    %c0_13 = arith.constant 0 : index
    %c0_14 = arith.constant 0 : index
    %15 = vector.load %arg7[%c0_13, %c0_14] : memref<32x1xf32, #tpu.memory_space<vmem>>, vector<32x1xf32>
    %16 = vector.broadcast %15 : vector<32x1xf32> to vector<32x2560xf32>
    %17 = arith.addf %14, %16 : vector<32x2560xf32>
    %cst_15 = arith.constant 0.000000e+00 : f32
    %18 = vector.broadcast %cst_15 : f32 to vector<32x2560xf32>
    %19 = arith.maximumf %17, %18 : vector<32x2560xf32>
    %c0_16 = arith.constant 0 : index
    %c0_17 = arith.constant 0 : index
    %20 = vector.load %arg8[%c0_16, %c0_17] : memref<8x32xbf16, #tpu.memory_space<vmem>>, vector<8x32xbf16>
    %21 = arith.truncf %19 : vector<32x2560xf32> to vector<32x2560xbf16>
    %cst_18 = arith.constant dense<0.000000e+00> : vector<8x2560xf32>
    %22 = tpu.matmul %20, %21, %cst_18 {dimension_numbers = #tpu.dot_dimension_numbers<[1], [0], [0], [1], [0, 0, 1, 1], [], []>} : vector<8x32xbf16>, vector<32x2560xbf16>, vector<8x2560xf32> -> vector<8x2560xf32>
    %c0_19 = arith.constant 0 : index
    %c0_20 = arith.constant 0 : index
    %23 = vector.load %arg9[%c0_19, %c0_20] : memref<8x1xf32, #tpu.memory_space<vmem>>, vector<8x1xf32>
    %24 = vector.broadcast %23 : vector<8x1xf32> to vector<8x2560xf32>
    %25 = arith.addf %22, %24 : vector<8x2560xf32>
    %c0_21 = arith.constant 0 : index
    %c0_22 = arith.constant 0 : index
    %26 = vector.load %arg10[%c0_21, %c0_22] : memref<8x2560xf32, #tpu.memory_space<vmem>>, vector<8x2560xf32>
    tpu.vector_store %arg10[%c0_21, %c0_22], %25 {strides = array<i32>} : memref<8x2560xf32, #tpu.memory_space<vmem>>, vector<8x2560xf32>,
    %c1_i32 = arith.constant 1 : i32
    %27 = arith.cmpi eq, %arg0, %c1_i32 : i32
    %28 = arith.extui %27 : i1 to i32
    %c0_i32 = arith.constant 0 : i32
    %29 = arith.cmpi ne, %28, %c0_i32 : i32
    scf.if %29 {
      %33 = tpu.iota {dimensions = array<i32: 1>} : vector<1x2560xi32>
      %c2440_i32 = arith.constant 2440 : i32
      %34 = vector.broadcast %c2440_i32 : i32 to vector<1x2560xi32>
      %35 = arith.cmpi slt, %33, %34 : vector<1x2560xi32>
      %36 = arith.extui %35 : vector<1x2560xi1> to vector<1x2560xi32>
      %37 = arith.sitofp %36 : vector<1x2560xi32> to vector<1x2560xf32>
      %38 = vector.broadcast %37 : vector<1x2560xf32> to vector<8x2560xf32>
      %39 = arith.mulf %25, %38 : vector<8x2560xf32>
      %cst_24 = arith.constant dense<0.000000e+00> : vector<8xf32>
      %40 = vector.multi_reduction <add>, %39, %cst_24 [1] : vector<8x2560xf32> to vector<8xf32>
      %41 = vector.shape_cast %40 : vector<8xf32> to vector<8x1xf32>
      %cst_25 = arith.constant 4.09836066E-4 : f32
      %42 = vector.broadcast %cst_25 : f32 to vector<8x1xf32>
      %43 = arith.mulf %41, %42 : vector<8x1xf32>
      %44 = vector.broadcast %43 : vector<8x1xf32> to vector<8x2560xf32>
      %45 = arith.subf %25, %44 : vector<8x2560xf32>
      %46 = vector.broadcast %37 : vector<1x2560xf32> to vector<8x2560xf32>
      %47 = arith.mulf %45, %46 : vector<8x2560xf32>
      %48 = vector.shape_cast %41 : vector<8x1xf32> to vector<1x8x1xf32>
      %c0_26 = arith.constant 0 : index
      %c0_27 = arith.constant 0 : index
      %c0_28 = arith.constant 0 : index
      %49 = vector.load %arg11[%c0_26, %c0_27, %c0_28] : memref<1x8x1xf32, #tpu.memory_space<vmem>>, vector<1x8x1xf32>
      tpu.vector_store %arg11[%c0_26, %c0_27, %c0_28], %48 {strides = array<i32>} : memref<1x8x1xf32, #tpu.memory_space<vmem>>, vector<1x8x1xf32>,
      %50 = arith.mulf %47, %47 : vector<8x2560xf32>
      %cst_29 = arith.constant dense<0.000000e+00> : vector<8xf32>
      %51 = vector.multi_reduction <add>, %50, %cst_29 [1] : vector<8x2560xf32> to vector<8xf32>
      %52 = vector.shape_cast %51 : vector<8xf32> to vector<8x1xf32>
      %53 = vector.shape_cast %52 : vector<8x1xf32> to vector<1x8x1xf32>
      %c0_30 = arith.constant 0 : index
      %c0_31 = arith.constant 0 : index
      %c0_32 = arith.constant 0 : index
      %54 = vector.load %arg12[%c0_30, %c0_31, %c0_32] : memref<1x8x1xf32, #tpu.memory_space<vmem>>, vector<1x8x1xf32>
      tpu.vector_store %arg12[%c0_30, %c0_31, %c0_32], %53 {strides = array<i32>} : memref<1x8x1xf32, #tpu.memory_space<vmem>>, vector<1x8x1xf32>,
    } else {
    }
    %true = arith.constant true
    %30 = arith.xori %27, %true : i1
    %31 = arith.extui %30 : i1 to i32
    %c0_i32_23 = arith.constant 0 : i32
    %32 = arith.cmpi ne, %31, %c0_i32_23 : i32
    scf.if %32 {
      %cst_24 = arith.constant dense<0.000000e+00> : vector<8xf32>
      %33 = vector.multi_reduction <add>, %25, %cst_24 [1] : vector<8x2560xf32> to vector<8xf32>
      %34 = vector.shape_cast %33 : vector<8xf32> to vector<8x1xf32>
      %cst_25 = arith.constant 3.906250e-04 : f32
      %35 = vector.broadcast %cst_25 : f32 to vector<8x1xf32>
      %36 = arith.mulf %34, %35 : vector<8x1xf32>
      %37 = vector.broadcast %36 : vector<8x1xf32> to vector<8x2560xf32>
      %38 = arith.subf %25, %37 : vector<8x2560xf32>
      %39 = vector.shape_cast %34 : vector<8x1xf32> to vector<1x8x1xf32>
      %c0_26 = arith.constant 0 : index
      %c0_27 = arith.constant 0 : index
      %c0_28 = arith.constant 0 : index
      %40 = vector.load %arg11[%c0_26, %c0_27, %c0_28] : memref<1x8x1xf32, #tpu.memory_space<vmem>>, vector<1x8x1xf32>
      tpu.vector_store %arg11[%c0_26, %c0_27, %c0_28], %39 {strides = array<i32>} : memref<1x8x1xf32, #tpu.memory_space<vmem>>, vector<1x8x1xf32>,
      %41 = arith.mulf %38, %38 : vector<8x2560xf32>
      %cst_29 = arith.constant dense<0.000000e+00> : vector<8xf32>
      %42 = vector.multi_reduction <add>, %41, %cst_29 [1] : vector<8x2560xf32> to vector<8xf32>
      %43 = vector.shape_cast %42 : vector<8xf32> to vector<8x1xf32>
      %44 = vector.shape_cast %43 : vector<8x1xf32> to vector<1x8x1xf32>
      %c0_30 = arith.constant 0 : index
      %c0_31 = arith.constant 0 : index
      %c0_32 = arith.constant 0 : index
      %45 = vector.load %arg12[%c0_30, %c0_31, %c0_32] : memref<1x8x1xf32, #tpu.memory_space<vmem>>, vector<1x8x1xf32>
      tpu.vector_store %arg12[%c0_30, %c0_31, %c0_32], %44 {strides = array<i32>} : memref<1x8x1xf32, #tpu.memory_space<vmem>>, vector<1x8x1xf32>,
    } else {
    }
    return
  }
  func.func @transform_0(%arg0: i32) -> (i32, i32) {
    %c0_i32 = arith.constant 0 : i32
    %c0_i32_0 = arith.constant 0 : i32
    return %c0_i32, %arg0 : i32, i32
  }
  func.func @transform_1(%arg0: i32) -> (i32, i32) {
    %c0_i32 = arith.constant 0 : i32
    %c0_i32_0 = arith.constant 0 : i32
    return %c0_i32, %arg0 : i32, i32
  }
  func.func @transform_2(%arg0: i32) -> (i32, i32) {
    %c0_i32 = arith.constant 0 : i32
    %c0_i32_0 = arith.constant 0 : i32
    return %c0_i32, %arg0 : i32, i32
  }
  func.func @transform_3(%arg0: i32) -> (i32, i32) {
    %c0_i32 = arith.constant 0 : i32
    %c0_i32_0 = arith.constant 0 : i32
    %c0_i32_1 = arith.constant 0 : i32
    return %c0_i32, %c0_i32_0 : i32, i32
  }
  func.func @transform_4(%arg0: i32) -> (i32, i32) {
    %c0_i32 = arith.constant 0 : i32
    %c0_i32_0 = arith.constant 0 : i32
    %c0_i32_1 = arith.constant 0 : i32
    return %c0_i32, %c0_i32_0 : i32, i32
  }
  func.func @transform_5(%arg0: i32) -> (i32, i32) {
    %c0_i32 = arith.constant 0 : i32
    %c0_i32_0 = arith.constant 0 : i32
    %c0_i32_1 = arith.constant 0 : i32
    return %c0_i32, %c0_i32_0 : i32, i32
  }
  func.func @transform_6(%arg0: i32) -> (i32, i32) {
    %c0_i32 = arith.constant 0 : i32
    %c0_i32_0 = arith.constant 0 : i32
    %c0_i32_1 = arith.constant 0 : i32
    return %c0_i32, %c0_i32_0 : i32, i32
  }
  func.func @transform_7(%arg0: i32) -> (i32, i32) {
    %c0_i32 = arith.constant 0 : i32
    %c0_i32_0 = arith.constant 0 : i32
    %c0_i32_1 = arith.constant 0 : i32
    return %c0_i32, %c0_i32_0 : i32, i32
  }
  func.func @transform_8(%arg0: i32) -> (i32, i32) {
    %c0_i32 = arith.constant 0 : i32
    %c0_i32_0 = arith.constant 0 : i32
    %c0_i32_1 = arith.constant 0 : i32
    return %c0_i32, %c0_i32_0 : i32, i32
  }
  func.func @transform_9(%arg0: i32) -> (i32, i32) {
    %c0_i32 = arith.constant 0 : i32
    %c0_i32_0 = arith.constant 0 : i32
    return %c0_i32, %arg0 : i32, i32
  }
  func.func @transform_10(%arg0: i32) -> (i32, i32, i32) {
    %c0_i32 = arith.constant 0 : i32
    %c0_i32_0 = arith.constant 0 : i32
    %c0_i32_1 = arith.constant 0 : i32
    return %arg0, %c0_i32, %c0_i32_0 : i32, i32, i32
  }
  func.func @transform_11(%arg0: i32) -> (i32, i32, i32) {
    %c0_i32 = arith.constant 0 : i32
    %c0_i32_0 = arith.constant 0 : i32
    %c0_i32_1 = arith.constant 0 : i32
    return %arg0, %c0_i32, %c0_i32_0 : i32, i32, i32
  }
}

</mosaic_0001>

<bundles_post_ra>
// kernel: edge_processor_forward.3
= control target key start
LH: loop header
LB: loop body
LE: loop exit
PB: predicated region body
PF: predicated region fallthrough
CT: control target
= control target key end

     0   :  { %9 = vsyncpa [#allocation3], 0  ;;  %s794_s0 = inlined_call_operand.vmem [shape: f32[8,5120], index: 0, kind: input, shape index: {}]   ;;  %s795_s1 = inlined_call_operand.vmem [shape: f32[8,5120], index: 1, kind: input, shape index: {}]   ;;  %s796_s2 = inlined_call_operand.vmem [shape: f32[8,1], index: 2, kind: input, shape index: {}]   ;;  %s797_s3 = inlined_call_operand.vmem [shape: f32[8,1], index: 3, kind: input, shape index: {}]   ;;  %s798_s4 = inlined_call_operand.hbm [shape: f32[8,5120], index: 4, kind: output, shape index: {}]  }
   0x1   :  { %11 = vsyncpa [#allocation3 + $0x1], 0  ;;  %s583_s15 = smov 0   ;;  %s585_s16 = smov 0  }
   0x2   :  { %s587_s17 = smov 0   ;;  %s589_s18 = smov 0  }
   0x3 LB: > { %s604_s19 = sadd.s32 4294967295, %s555_s18   ;;  %s441_s20 = sadd.s32 4294967294, %s555_s18   ;;  %s555_s18 = sphi %s589_s18, %s804_s18   ;;  %s551_s17 = sphi %s587_s17, %s803_s17   ;;  %s547_s16 = sphi %s585_s16, %s802_s16   ;;  %s543_s15 = sphi %s583_s15, %s801_s15  }
   0x4   : > { %s608_s21 = sadd.s32 1, %s555_s18   ;;  %s118_s22 = sadd.s32 1, %s551_s17 }
   0x5   : > { %s115_s23 = ssub.s32 %s555_s18, %s608_s21  ;;  %p128_p0 = scmp.ne.s32.totalorder %s551_s17, %s547_s16 }
   0x6   : > { %p116_p1 = scmp.eq.s32.totalorder %s115_s23, 0  ;;  %p129_p2 = scmp.eq.s32.totalorder %s604_s19, 1 }
   0x7   : > { %p134_p3 = scmp.ne.s32.totalorder %s547_s16, %s543_s15  ;;  %p135_p4 = scmp.eq.s32.totalorder %s441_s20, 1 }
   0x8   : > { %s619_s24 = scalar_select %p116_p1, %s551_s17, %s118_s22  }
   0x9   : > { %p621_p5 = por %p129_p2, %p128_p0  ;;  %p625_p6 = por %p135_p4, %p134_p3 }
   0xa   : > { %p444_p7 = scmp.ge.s32.totalorder %s555_s18, 1  ;;  %p177_p8 = scmp.lt.s32.totalorder %s555_s18, 3 }
   0xc   : > { %p178_p9 = pnand %p444_p7, %p177_p8 }
   0xd   : > { %s208_s5 = smul.u32 (!%p178_p9), 20, %s604_s19  ;;  %s205_s10 = sand.u32 (!%p178_p9), 1, %s547_s16  }
   0xe   : > { %181 = sbr.rel (%p178_p9) target bundleno = 170 (0xaa), region = 36  ;;  %s354_s30 = scalar_lea.sflag (!%p178_p9), [#allocation3], %s205_s10 }
   0xf   : > { %p209_p10 = scmp.lt.s32.totalorder (!%p178_p9), %s208_s5, 39  ;;  %s664_s14 = smul.u32 (!%p178_p9), 160, %s205_s10 }
  0x10   : > { %s450_s22 = smul.u32 (!%p178_p9), 160, %s604_s19 }
  0x11   : > { %s700_s20 = scalar_lea.vmem (!%p178_p9), [#allocation2], %s664_s14 }
  0x12   : > { %s365_s27 = scalar_lea.hbm (!%p178_p9), %s798_s4, %s450_s22  ;;  %s367_s28 = sshll.u32 (!%p178_p9), %s700_s20, 4  ;;  %s368_s28 = int_to_ptr.vmem [resolvable:$true] %s367_s28 }
  0x13   : > { %v241_v0 = vld [vmem:[%s796_s2] sm:$0xff]  ;;  %v557_v1 = vmov 0   ;;  %s806_s5 = smov (!%p209_p10, %s208_s5), 39  ;;  %s369_s29 = sshll.u32 %s365_s27, 4  ;;  %s370_s29 = int_to_ptr.hbm [resolvable:$true] %s369_s29 }
  0x14   : > { %492 = vset.pattern.permute.xlu0 %v557_v1  ;;  %v267_v2 = vld [vmem:[%s797_s3] sm:$0xff]  ;;  %s445_s6 = sshll.u32 %s806_s5, 3  ;;  %s507_s5 = sshra.s32 %s370_s29, 4  ;;  %s508_s5 = int_to_ptr.hbm [resolvable:$true] %s507_s5 }
  0x15   : > { %244 = vperm.xlu0 %492, %v241_v0   ;;  %s643_s9 = scalar_lea.vmem %s794_s0, %s445_s6  ;;  %s656_s13 = scalar_lea.vmem %s795_s1, %s445_s6 }
  0x16   : > { %v221_v4 = vld [vmem:[%s643_s9] sm:$0xff]  ;;  %v222_v5 = vld [vmem:[%s643_s9 + $0x8] sm:$0xff]  ;;  %v223_v6 = vld [vmem:[%s643_s9 + $0x10] sm:$0xff]  ;;  %s509_s6 = scalar_lea.hbm %s508_s5, 160  ;;  %p514_p0 = scmp.lt.s32.totalorder %s508_s5, %s798_s4 }
  0x17   : > { %v224_v7 = vld [vmem:[%s643_s9 + $0x18] sm:$0xff]  ;;  %v225_v8 = vld [vmem:[%s643_s9 + $0x20] sm:$0xff]  ;;  %v226_v10 = vld [vmem:[%s643_s9 + $0x28] sm:$0xff]  ;;  %p510_p11 = scmp.ne.s32.totalorder %s508_s5, %s509_s6 }
  0x18   : > { %v227_v14 = vld [vmem:[%s643_s9 + $0x30] sm:$0xff]  ;;  %v228_v16 = vld [vmem:[%s643_s9 + $0x38] sm:$0xff]  ;;  %v229_v17 = vld [vmem:[%s643_s9 + $0x40] sm:$0xff] }
  0x19   : > { %v293_v24 = vld [vmem:[%s656_s13] sm:$0xff]  ;;  %v294_v25 = vld [vmem:[%s656_s13 + $0x8] sm:$0xff]  ;;  %v295_v26 = vld [vmem:[%s656_s13 + $0x10] sm:$0xff]  ;;  %p511_p12 = pnand %p510_p11, %p621_p5 }
  0x1a   : > { %v230_v27 = vld [vmem:[%s643_s9 + $0x48] sm:$0xff]  ;;  %v296_v30 = vld [vmem:[%s656_s13 + $0x18] sm:$0xff]  ;;  %v231_v31 = vld [vmem:[%s643_s9 + $0x50] sm:$0xff] }
  0x1b   : > { %v297_v35 = vld [vmem:[%s656_s13 + $0x20] sm:$0xff]  ;;  %v232_v36 = vld [vmem:[%s643_s9 + $0x58] sm:$0xff]  ;;  %v298_v38 = vld [vmem:[%s656_s13 + $0x28] sm:$0xff]  ;;  %p512_p13 = pneg %p511_p12 }
  0x1c   : > { %v233_v42 = vld [vmem:[%s643_s9 + $0x60] sm:$0xff]  ;;  %v299_v45 = vld [vmem:[%s656_s13 + $0x30] sm:$0xff]  ;;  %v234_v47 = vld [vmem:[%s643_s9 + $0x68] sm:$0xff] }
  0x1d   : > { %270 = vperm.xlu0 %492, %v267_v2   ;;  %v300_v50 = vld [vmem:[%s656_s13 + $0x38] sm:$0xff]  ;;  %v235_v52 = vld [vmem:[%s643_s9 + $0x70] sm:$0xff]  ;;  %v301_v55 = vld [vmem:[%s656_s13 + $0x40] sm:$0xff] }
  0x1e   : > { %v236_v57 = vld [vmem:[%s643_s9 + $0x78] sm:$0xff]  ;;  %v302_v60 = vld [vmem:[%s656_s13 + $0x48] sm:$0xff]  ;;  %v237_v62 = vld [vmem:[%s643_s9 + $0x80] sm:$0xff] }
  0x1f   : > { %v303_v1 = vld [vmem:[%s656_s13 + $0x50] sm:$0xff] }
  0x87   : > { %v638_v3 = vpop.permute.xlu0 %244 }
  0x88   : > { %v247_v11 = vmul.f32 %v638_v3, %v221_v4  ;;  %v248_v12 = vmul.f32 %v638_v3, %v222_v5  ;;  %v249_v13 = vmul.f32 %v638_v3, %v223_v6  ;;  %v250_v15 = vmul.f32 %v638_v3, %v224_v7  ;;  %v238_v4 = vld [vmem:[%s643_s9 + $0x88] sm:$0xff]  ;;  %v304_v7 = vld [vmem:[%s656_s13 + $0x58] sm:$0xff] }
  0x89   : > { %v251_v18 = vmul.f32 %v638_v3, %v225_v8  ;;  %v252_v22 = vmul.f32 %v638_v3, %v226_v10  ;;  %v253_v28 = vmul.f32 %v638_v3, %v227_v14  ;;  %v254_v32 = vmul.f32 %v638_v3, %v228_v16  ;;  %v239_v10 = vld [vmem:[%s643_s9 + $0x90] sm:$0xff] }
  0x8a   : > { %v255_v33 = vmul.f32 %v638_v3, %v229_v17  ;;  %v256_v43 = vmul.f32 %v638_v3, %v230_v27  ;;  %v257_v48 = vmul.f32 %v638_v3, %v231_v31  ;;  %v258_v53 = vmul.f32 %v638_v3, %v232_v36  ;;  %v311_v36 = vld [vmem:[%s656_s13 + $0x90] sm:$0xff] }
  0x8b   : > { %v259_v58 = vmul.f32 %v638_v3, %v233_v42  ;;  %v260_v63 = vmul.f32 %v638_v3, %v234_v47  ;;  %v261_v5 = vmul.f32 %v638_v3, %v235_v52  ;;  %v263_v16 = vmul.f32 %v638_v3, %v237_v62 }
  0x8f   : > { %v651_v9 = vpop.permute.xlu0 %270 }
  0x90   : > { %v273_v19 = vadd.f32 %v651_v9, %v247_v11  ;;  %v274_v20 = vadd.f32 %v651_v9, %v248_v12  ;;  %v275_v21 = vadd.f32 %v651_v9, %v249_v13  ;;  %v276_v23 = vadd.f32 %v651_v9, %v250_v15  ;;  %v305_v13 = vld [vmem:[%s656_s13 + $0x60] sm:$0xff]  ;;  %v240_v15 = vld [vmem:[%s643_s9 + $0x98] sm:$0xff]  ;;  %s513_s9 = scalar_lea.hbm %s798_s4, 320 }
  0x91   : > { %v277_v29 = vadd.f32 %v651_v9, %v251_v18  ;;  %v278_v34 = vadd.f32 %v651_v9, %v252_v22  ;;  %v279_v37 = vadd.f32 %v651_v9, %v253_v28  ;;  %v280_v44 = vadd.f32 %v651_v9, %v254_v32  ;;  %v306_v18 = vld [vmem:[%s656_s13 + $0x68] sm:$0xff]  ;;  %v307_v22 = vld [vmem:[%s656_s13 + $0x70] sm:$0xff]  ;;  %p515_p1 = scmp.lt.s32.totalorder %s513_s9, %s509_s6 }
  0x92   : > { %v313_v39 = vadd.f32 %v293_v24, %v273_v19  ;;  %v314_v40 = vadd.f32 %v294_v25, %v274_v20  ;;  %v315_v41 = vadd.f32 %v295_v26, %v275_v21  ;;  %v316_v46 = vadd.f32 %v296_v30, %v276_v23  ;;  %v308_v26 = vld [vmem:[%s656_s13 + $0x78] sm:$0xff]  ;;  %v309_v30 = vld [vmem:[%s656_s13 + $0x80] sm:$0xff] }
  0x93   : > { %v281_v49 = vadd.f32 %v651_v9, %v255_v33  ;;  %v317_v51 = vadd.f32 %v297_v35, %v277_v29  ;;  %v282_v54 = vadd.f32 %v651_v9, %v256_v43  ;;  %v318_v56 = vadd.f32 %v298_v38, %v278_v34  ;;  %v310_v33 = vld [vmem:[%s656_s13 + $0x88] sm:$0xff]  ;;  %p516_p2 = por %p515_p1, %p514_p0 }
  0x94   : > { %333 = vst [vmem:[%s700_s20] sm:$0xff] %v313_v39  ;;  %v283_v59 = vadd.f32 %v651_v9, %v257_v48  ;;  %v319_v61 = vadd.f32 %v299_v45, %v279_v37  ;;  %v284_v0 = vadd.f32 %v651_v9, %v258_v53  ;;  %v320_v2 = vadd.f32 %v300_v50, %v280_v44  ;;  %v312_v37 = vld [vmem:[%s656_s13 + $0x98] sm:$0xff] }
  0x95   : > { %334 = vst [vmem:[%s700_s20 + $0x8] sm:$0xff] %v314_v40  ;;  %v285_v6 = vadd.f32 %v651_v9, %v259_v58  ;;  %v321_v8 = vadd.f32 %v301_v55, %v281_v49  ;;  %v262_v11 = vmul.f32 %v638_v3, %v236_v57  ;;  %v286_v12 = vadd.f32 %v651_v9, %v260_v63  ;;  %p517_p3 = pnand %p516_p2, %p512_p13 }
  0x96   : > { %335 = vst [vmem:[%s700_s20 + $0x10] sm:$0xff] %v315_v41  ;;  %v322_v14 = vadd.f32 %v302_v60, %v282_v54  ;;  %v287_v17 = vadd.f32 %v651_v9, %v261_v5  ;;  %v323_v19 = vadd.f32 %v303_v1, %v283_v59  ;;  %v264_v20 = vmul.f32 %v638_v3, %v238_v4 }
  0x97   : > { %336 = vst [vmem:[%s700_s20 + $0x18] sm:$0xff] %v316_v46  ;;  %v288_v21 = vadd.f32 %v651_v9, %v262_v11  ;;  %v324_v23 = vadd.f32 %v304_v7, %v284_v0  ;;  %v265_v24 = vmul.f32 %v638_v3, %v239_v10  ;;  %v289_v25 = vadd.f32 %v651_v9, %v263_v16 }
  0x98   : > { %337 = vst [vmem:[%s700_s20 + $0x20] sm:$0xff] %v317_v51  ;;  %v325_v27 = vadd.f32 %v305_v13, %v285_v6  ;;  %v266_v28 = vmul.f32 %v638_v3, %v240_v15  ;;  %v290_v29 = vadd.f32 %v651_v9, %v264_v20  ;;  %v326_v31 = vadd.f32 %v306_v18, %v286_v12 }
  0x99   : > { %338 = vst [vmem:[%s700_s20 + $0x28] sm:$0xff] %v318_v56  ;;  %v291_v32 = vadd.f32 %v651_v9, %v265_v24  ;;  %v327_v34 = vadd.f32 %v307_v22, %v287_v17  ;;  %v328_v3 = vadd.f32 %v308_v26, %v288_v21  ;;  %v329_v38 = vadd.f32 %v309_v30, %v289_v25 }
  0x9a   : > { %339 = vst [vmem:[%s700_s20 + $0x30] sm:$0xff] %v319_v61  ;;  %v292_v35 = vadd.f32 %v651_v9, %v266_v28  ;;  %v330_v39 = vadd.f32 %v310_v33, %v290_v29 }
  0x9b   : > { %340 = vst [vmem:[%s700_s20 + $0x38] sm:$0xff] %v320_v2  ;;  %v331_v40 = vadd.f32 %v311_v36, %v291_v32 }
  0x9c   : > { %341 = vst [vmem:[%s700_s20 + $0x40] sm:$0xff] %v321_v8  ;;  %v332_v9 = vadd.f32 %v312_v37, %v292_v35 }
  0x9d   : > { %342 = vst [vmem:[%s700_s20 + $0x48] sm:$0xff] %v322_v14 }
  0x9e   : > { %343 = vst [vmem:[%s700_s20 + $0x50] sm:$0xff] %v323_v19 }
  0x9f   : > { %344 = vst [vmem:[%s700_s20 + $0x58] sm:$0xff] %v324_v23 }
  0xa0   : > { %345 = vst [vmem:[%s700_s20 + $0x60] sm:$0xff] %v325_v27 }
  0xa1   : > { %346 = vst [vmem:[%s700_s20 + $0x68] sm:$0xff] %v326_v31 }
  0xa2   : > { %347 = vst [vmem:[%s700_s20 + $0x70] sm:$0xff] %v327_v34 }
  0xa3   : > { %348 = vst [vmem:[%s700_s20 + $0x78] sm:$0xff] %v328_v3 }
  0xa4   : > { %349 = vst [vmem:[%s700_s20 + $0x80] sm:$0xff] %v329_v38 }
  0xa5   : > { %350 = vst [vmem:[%s700_s20 + $0x88] sm:$0xff] %v330_v39 }
  0xa6   : > { %351 = vst [vmem:[%s700_s20 + $0x90] sm:$0xff] %v331_v40 }
  0xa7   : > { %352 = vst [vmem:[%s700_s20 + $0x98] sm:$0xff] %v332_v9 }
  0xa8   : > { %520 = shalt.err (!%p517_p3)
}
  0xa9   : > { %452 = dma.vmem_to_hbm [thread:$0]  (%p621_p5), %s368_s28, 2560, %s370_s29, %s354_s30  }
  0xaa PF: > { %p458_p4 = scmp.ge.s32.totalorder %s555_s18, 2  ;;  %s381_s10 = sand.u32 1, %s543_s15  }
  0xab   : > { %s382_s13 = scalar_lea.sflag [#allocation3], %s381_s10 }
  0xac   : > { %p455_p7 = pnand %p458_p4, %p625_p6 }
  0xae   : > { %p456_p8 = pneg %p455_p7 }
  0xb0   : > { %538 = dma.done.wait (%p456_p8), %s382_s13, 2560  }
  0xb1   : > { %540 = vsyncadd (%p456_p8), %s382_s13, 4294964736  ;;  %p14_p9 = scmp.ge.s32.totalorder %s608_s21, 4   ;;  %s801_s15 = smov %s547_s16 }
  0xb2   : > { %s802_s16 = smov %s551_s17  ;;  %s803_s17 = smov %s619_s24 }
  0xb3   : > { %s804_s18 = smov %s608_s21  ;;  %16 = sbr.rel (!%p14_p9) target bundleno = 3 (0x3), region = 74 }
  0xb8   :  { %388 = vsyncpa [#allocation3], 1 }
  0xb9   :  { %390 = vsyncpa [#allocation3 + $0x1], 1 }

// kernel: edge_processor_forward.2
= control target key start
LH: loop header
LB: loop body
LE: loop exit
PB: predicated region body
PF: predicated region fallthrough
CT: control target
= control target key end

     0   :  { %s2659_s17 = smov 0   ;;  %s3415_s0 = inlined_call_operand.vmem [shape: f32[8,5120], index: 0, kind: input, shape index: {}]   ;;  %s3416_s1 = inlined_call_operand.vmem [shape: f32[8,5120], index: 1, kind: input, shape index: {}]   ;;  %s3417_s2 = inlined_call_operand.vmem [shape: f32[8,5120], index: 2, kind: input, shape index: {}]   ;;  %s3418_s3 = inlined_call_operand.vmem [shape: bf16[32,24], index: 3, kind: input, shape index: {}]   ;;  %s3419_s4 = inlined_call_operand.vmem [shape: f32[32,1], index: 4, kind: input, shape index: {}]   ;;  %s3420_s5 = inlined_call_operand.vmem [shape: bf16[32,32], index: 5, kind: input, shape index: {}]   ;;  %s3421_s6 = inlined_call_operand.vmem [shape: f32[32,1], index: 6, kind: input, shape index: {}]   ;;  %s3422_s7 = inlined_call_operand.vmem [shape: bf16[8,32], index: 7, kind: input, shape index: {}]   ;;  %s3423_s8 = inlined_call_operand.vmem [shape: f32[8,1], index: 8, kind: input, shape index: {}]   ;;  %s3424_s9 = inlined_call_operand.vmem [shape: f32[8,5120], index: 9, kind: output, shape index: {0}]   ;;  %s3425_s10 = inlined_call_operand.vmem [shape: f32[2,8,1], index: 10, kind: output, shape index: {1}]   ;;  %s3426_s11 = inlined_call_operand.vmem [shape: f32[2,8,1], index: 11, kind: output, shape index: {2}]  }
   0x1 LB: > { %s2665_s18 = sadd.s32 4294967295, %s2595_s17   ;;  %p2444_p0 = scmp.ge.s32.totalorder %s2595_s17, 1  ;;  %s2595_s17 = sphi %s2659_s17, %s22_s17  }
   0x2   : > { %p365_p1 = scmp.lt.s32.totalorder %s2595_s17, 3 }
   0x4   : > { %p366_p2 = pnand %p2444_p0, %p365_p1 }
   0x5   : > { %s423_s19 = smul.u32 (!%p366_p2), 20, %s2665_s18  ;;  %p447_p3 = scmp.lt.s32.totalorder (!%p366_p2), %s2665_s18, 1 }
   0x6   : > { %369 = sbr.rel (%p366_p2) target bundleno = 1271 (0x4f7), region = 56  ;;  %p2567_p5 = scmp.ne.s32.totalorder (!%p366_p2), %s2665_s18, 1 }
   0x7   : > { %p424_p4 = scmp.lt.s32.totalorder (!%p366_p2), %s423_s19, 39 }
   0xb   : > { %v2597_v0 = vmov 0   ;;  %s448_s20 = scalar_select %p447_p3, %s2665_s18, 1  ;;  %v562_v1 = vld [vmem:[%s3419_s4 + $0x10] sm:$0xff]  ;;  %v560_v2 = vld [vmem:[%s3419_s4] sm:$0xff]  ;;  %vm601_vm0 = vcmask 1043456   ;;  %v563_v12 = vld [vmem:[%s3419_s4 + $0x18] sm:$0xff] }
   0xc   : > { %2587 = vset.pattern.permute.xlu1 %v2597_v0  ;;  %2586 = vset.pattern.permute.xlu0 %v2597_v0  ;;  %s3428_s19 = smov (!%p424_p4, %s423_s19), 39  ;;  %v561_v13 = vld [vmem:[%s3419_s4 + $0x8] sm:$0xff]  ;;  %v2737_v35 = vld [vmem:[%s3418_s3] sm:$0xff]  ;;  %vm594_vm1 = vcmask 195584   ;;  %vm1200_vm2 = vcmask 261120  }
   0xd   : > { %2588 = vset.pattern.permute.xlu2 %v2597_v0  ;;  %s2449_s25 = sshll.u32 %s448_s20, 3  ;;  %576 = vperm.xlu0 %2586, %v562_v1   ;;  %s2678_s26 = sshll.u32 %s3428_s19, 3  ;;  %v1166_v52 = vld [vmem:[%s3421_s6] sm:$0xff]  ;;  %v1167_v55 = vld [vmem:[%s3421_s6 + $0x8] sm:$0xff] }
   0xe   : > { %566 = vperm.xlu1 %2587, %v560_v2   ;;  %s2683_s29 = scalar_lea.vmem %s3425_s10, %s2449_s25  ;;  %s2689_s13 = scalar_lea.vmem %s3417_s2, %s2678_s26  ;;  %v2768_v56 = vld [vmem:[%s3418_s3 + $0x8] sm:$0xff] }
   0xf   : > { %s2694_s16 = scalar_lea.vmem %s3426_s11, %s2449_s25  ;;  %v496_v3 = vld [vmem:[%s2689_s13] sm:$0xff]  ;;  %v497_v4 = vld [vmem:[%s2689_s13 + $0x8] sm:$0xff]  ;;  %v498_v5 = vld [vmem:[%s2689_s13 + $0x10] sm:$0xff]  ;;  %s2703_s21 = scalar_lea.vmem %s3415_s0, %s2678_s26 }
  0x10   : > { %s2709_s24 = scalar_lea.vmem %s3416_s1, %s2678_s26  ;;  %v536_v6 = vpack.c.bf16 %v496_v3, %v496_v3  ;;  %v537_v7 = vpack.c.bf16 %v497_v4, %v497_v4  ;;  %v538_v8 = vpack.c.bf16 %v498_v5, %v498_v5  ;;  %v499_v9 = vld [vmem:[%s2689_s13 + $0x18] sm:$0xff]  ;;  %v456_v10 = vld [vmem:[%s2703_s21] sm:$0xff]  ;;  %v457_v15 = vld [vmem:[%s2703_s21 + $0x8] sm:$0xff] }
  0x11   : > { %v476_v11 = vld [vmem:[%s2709_s24] sm:$0xff]  ;;  %v539_v14 = vpack.c.bf16 %v499_v9, %v499_v9  ;;  %v477_v16 = vld [vmem:[%s2709_s24 + $0x8] sm:$0xff]  ;;  %v458_v17 = vld [vmem:[%s2703_s21 + $0x10] sm:$0xff] }
  0x12   : > { %v603_v18 = vsel %vm601_vm0, %v536_v6, 0  ;;  %v606_v19 = vsel %vm601_vm0, %v537_v7, 0  ;;  %v609_v20 = vsel %vm601_vm0, %v538_v8, 0  ;;  %v478_v21 = vld [vmem:[%s2709_s24 + $0x10] sm:$0xff]  ;;  %v459_v22 = vld [vmem:[%s2703_s21 + $0x18] sm:$0xff]  ;;  %v516_v25 = vpack.c.bf16 %v476_v11, %v456_v10  ;;  %v500_v28 = vld [vmem:[%s2689_s13 + $0x20] sm:$0xff] }
  0x13   : > { %v479_v23 = vld [vmem:[%s2709_s24 + $0x18] sm:$0xff]  ;;  %668 = vmatpush.bf16.msra.mxu0 %v603_v18  ;;  %687 = vmatpush.bf16.msra.mxu1 %v606_v19  ;;  %v612_v24 = vsel %vm601_vm0, %v539_v14, 0  ;;  %v517_v26 = vpack.c.bf16 %v477_v16, %v457_v15  ;;  %v518_v27 = vpack.c.bf16 %v478_v21, %v458_v17  ;;  %v501_v29 = vld [vmem:[%s2689_s13 + $0x28] sm:$0xff]  ;;  %v502_v30 = vld [vmem:[%s2689_s13 + $0x30] sm:$0xff]  ;;  %v540_v32 = vpack.c.bf16 %v500_v28, %v500_v28 }
  0x14   : > { %706 = vmatpush.bf16.msra.mxu2 %v609_v20  ;;  %725 = vmatpush.bf16.msra.mxu3 %v612_v24  ;;  %v519_v31 = vpack.c.bf16 %v479_v23, %v459_v22  ;;  %v541_v33 = vpack.c.bf16 %v501_v29, %v501_v29  ;;  %v503_v34 = vld [vmem:[%s2689_s13 + $0x38] sm:$0xff]  ;;  %v542_v36 = vpack.c.bf16 %v502_v30, %v502_v30  ;;  %v460_v38 = vld [vmem:[%s2703_s21 + $0x20] sm:$0xff]  ;;  %v461_v42 = vld [vmem:[%s2703_s21 + $0x28] sm:$0xff] }
  0x15   : > { %581 = vperm.xlu0 %2586, %v563_v12   ;;  %v543_v37 = vpack.c.bf16 %v503_v34, %v503_v34  ;;  %v615_v39 = vsel %vm601_vm0, %v540_v32, 0  ;;  %v480_v41 = vld [vmem:[%s2709_s24 + $0x20] sm:$0xff]  ;;  %v481_v43 = vld [vmem:[%s2709_s24 + $0x28] sm:$0xff]  ;;  %v462_v44 = vld [vmem:[%s2703_s21 + $0x30] sm:$0xff] }
  0x16   : > { %571 = vperm.xlu1 %2587, %v561_v13   ;;  %v618_v40 = vsel %vm601_vm0, %v541_v33, 0  ;;  %v621_v45 = vsel %vm601_vm0, %v542_v36, 0  ;;  %v520_v47 = vpack.c.bf16 %v480_v41, %v460_v38  ;;  %v521_v48 = vpack.c.bf16 %v481_v43, %v461_v42  ;;  %v482_v49 = vld [vmem:[%s2709_s24 + $0x30] sm:$0xff]  ;;  %v463_v50 = vld [vmem:[%s2703_s21 + $0x38] sm:$0xff]  ;;  %v504_v57 = vld [vmem:[%s2689_s13 + $0x40] sm:$0xff] }
  0x17   : > { %669 = vmatpush.bf16.msra.mxu0 %v516_v25  ;;  %688 = vmatpush.bf16.msra.mxu1 %v517_v26  ;;  %v624_v46 = vsel %vm601_vm0, %v543_v37, 0  ;;  %v483_v51 = vld [vmem:[%s2709_s24 + $0x38] sm:$0xff]  ;;  %v522_v53 = vpack.c.bf16 %v482_v49, %v462_v44  ;;  %v505_v58 = vld [vmem:[%s2689_s13 + $0x48] sm:$0xff]  ;;  %v506_v59 = vld [vmem:[%s2689_s13 + $0x50] sm:$0xff]  ;;  %v544_v60 = vpack.c.bf16 %v504_v57, %v504_v57 }
  0x18   : > { %707 = vmatpush.bf16.msra.mxu2 %v518_v27  ;;  %726 = vmatpush.bf16.msra.mxu3 %v519_v31  ;;  %v523_v54 = vpack.c.bf16 %v483_v51, %v463_v50  ;;  %v545_v61 = vpack.c.bf16 %v505_v58, %v505_v58  ;;  %v546_v62 = vpack.c.bf16 %v506_v59, %v506_v59  ;;  %v507_v63 = vld [vmem:[%s2689_s13 + $0x58] sm:$0xff]  ;;  %v464_v0 = vld [vmem:[%s2703_s21 + $0x40] sm:$0xff]  ;;  %v465_v3 = vld [vmem:[%s2703_s21 + $0x48] sm:$0xff] }
  0x19   : > { %v484_v1 = vld [vmem:[%s2709_s24 + $0x40] sm:$0xff]  ;;  %v547_v2 = vpack.c.bf16 %v507_v63, %v507_v63  ;;  %v485_v4 = vld [vmem:[%s2709_s24 + $0x48] sm:$0xff]  ;;  %v466_v5 = vld [vmem:[%s2703_s21 + $0x50] sm:$0xff]  ;;  %v627_v6 = vsel %vm601_vm0, %v544_v60, 0 }
  0x1a   : > { %2459 = vmatmul.msk.bf16.vlgmr.msra.gmra.mxu0 %vm594_vm1, %v2737_v35  ;;  %2461 = vmatmul.msk.bf16.vlgmr.msra.gmra.mxu1 %vm594_vm1, %v2737_v35  ;;  %v630_v7 = vsel %vm601_vm0, %v545_v61, 0  ;;  %v633_v8 = vsel %vm601_vm0, %v546_v62, 0  ;;  %v486_v9 = vld [vmem:[%s2709_s24 + $0x50] sm:$0xff]  ;;  %v467_v10 = vld [vmem:[%s2703_s21 + $0x58] sm:$0xff]  ;;  %v524_v13 = vpack.c.bf16 %v484_v1, %v464_v0  ;;  %v525_v14 = vpack.c.bf16 %v485_v4, %v465_v3  ;;  %v508_v17 = vld [vmem:[%s2689_s13 + $0x60] sm:$0xff] }
  0x1b   : > { %744 = vmatpush.bf16.msrb.mxu0 %v615_v39  ;;  %763 = vmatpush.bf16.msrb.mxu1 %v618_v40  ;;  %v487_v11 = vld [vmem:[%s2709_s24 + $0x58] sm:$0xff]  ;;  %v636_v12 = vsel %vm601_vm0, %v547_v2, 0  ;;  %v526_v15 = vpack.c.bf16 %v486_v9, %v466_v5  ;;  %v509_v18 = vld [vmem:[%s2689_s13 + $0x68] sm:$0xff]  ;;  %v510_v19 = vld [vmem:[%s2689_s13 + $0x70] sm:$0xff]  ;;  %v548_v20 = vpack.c.bf16 %v508_v17, %v508_v17 }
  0x1c   : > { %2463 = vmatmul.msk.bf16.vlgmr.msra.gmra.mxu2 %vm594_vm1, %v2737_v35  ;;  %2465 = vmatmul.msk.bf16.vlgmr.msra.gmra.mxu3 %vm594_vm1, %v2737_v35  ;;  %v527_v16 = vpack.c.bf16 %v487_v11, %v467_v10  ;;  %v549_v21 = vpack.c.bf16 %v509_v18, %v509_v18  ;;  %v550_v22 = vpack.c.bf16 %v510_v19, %v510_v19  ;;  %v511_v23 = vld [vmem:[%s2689_s13 + $0x78] sm:$0xff]  ;;  %v468_v24 = vld [vmem:[%s2703_s21 + $0x60] sm:$0xff]  ;;  %v469_v27 = vld [vmem:[%s2703_s21 + $0x68] sm:$0xff] }
  0x1d   : > { %782 = vmatpush.bf16.msrb.mxu2 %v621_v45  ;;  %801 = vmatpush.bf16.msrb.mxu3 %v624_v46  ;;  %v488_v25 = vld [vmem:[%s2709_s24 + $0x60] sm:$0xff]  ;;  %v551_v26 = vpack.c.bf16 %v511_v23, %v511_v23  ;;  %v489_v28 = vld [vmem:[%s2709_s24 + $0x68] sm:$0xff]  ;;  %v470_v29 = vld [vmem:[%s2703_s21 + $0x70] sm:$0xff]  ;;  %v639_v30 = vsel %vm601_vm0, %v548_v20, 0 }
  0x1e   : > { %1172 = vperm.xlu0 %2586, %v1166_v52   ;;  %1177 = vperm.xlu1 %2587, %v1167_v55   ;;  %v642_v31 = vsel %vm601_vm0, %v549_v21, 0  ;;  %v645_v32 = vsel %vm601_vm0, %v550_v22, 0  ;;  %v490_v33 = vld [vmem:[%s2709_s24 + $0x70] sm:$0xff]  ;;  %v471_v34 = vld [vmem:[%s2703_s21 + $0x78] sm:$0xff]  ;;  %v528_v38 = vpack.c.bf16 %v488_v25, %v468_v24  ;;  %v529_v39 = vpack.c.bf16 %v489_v28, %v469_v27  ;;  %v512_v42 = vld [vmem:[%s2689_s13 + $0x80] sm:$0xff] }
  0x1f   : > { %745 = vmatpush.bf16.msrb.mxu0 %v520_v47  ;;  %764 = vmatpush.bf16.msrb.mxu1 %v521_v48  ;;  %v491_v36 = vld [vmem:[%s2709_s24 + $0x78] sm:$0xff]  ;;  %v648_v37 = vsel %vm601_vm0, %v551_v26, 0  ;;  %v530_v40 = vpack.c.bf16 %v490_v33, %v470_v29  ;;  %v513_v43 = vld [vmem:[%s2689_s13 + $0x88] sm:$0xff]  ;;  %v514_v44 = vld [vmem:[%s2689_s13 + $0x90] sm:$0xff]  ;;  %v552_v45 = vpack.c.bf16 %v512_v42, %v512_v42 }
  0x20   : > { %v531_v41 = vpack.c.bf16 %v491_v36, %v471_v34  ;;  %v553_v46 = vpack.c.bf16 %v513_v43, %v513_v43  ;;  %v554_v47 = vpack.c.bf16 %v514_v44, %v514_v44  ;;  %v515_v48 = vld [vmem:[%s2689_s13 + $0x98] sm:$0xff]  ;;  %v492_v55 = vld [vmem:[%s2709_s24 + $0x80] sm:$0xff]  ;;  %v473_v57 = vld [vmem:[%s2703_s21 + $0x88] sm:$0xff]  ;;  %s3202_s13 = scalar_lea.vmem %s3424_s9, %s2678_s26 }
  0x21   : > { %783 = vmatpush.bf16.msrb.mxu2 %v522_v53  ;;  %802 = vmatpush.bf16.msrb.mxu3 %v523_v54  ;;  %v555_v49 = vpack.c.bf16 %v515_v48, %v515_v48  ;;  %v651_v50 = vsel %vm601_vm0, %v552_v45, 0  ;;  %v472_v54 = vld [vmem:[%s2703_s21 + $0x80] sm:$0xff]  ;;  %v493_v59 = vld [vmem:[%s2709_s24 + $0x88] sm:$0xff]  ;;  %v474_v60 = vld [vmem:[%s2703_s21 + $0x90] sm:$0xff] }
  0x22   : > { %v654_v51 = vsel %vm601_vm0, %v553_v46, 0  ;;  %v657_v52 = vsel %vm601_vm0, %v554_v47, 0  ;;  %v532_v58 = vpack.c.bf16 %v492_v55, %v472_v54  ;;  %v494_v61 = vld [vmem:[%s2709_s24 + $0x90] sm:$0xff]  ;;  %v533_v62 = vpack.c.bf16 %v493_v59, %v473_v57  ;;  %v475_v0 = vld [vmem:[%s2703_s21 + $0x98] sm:$0xff]  ;;  %v2917_v57 = vld [vmem:[%s3420_s5] sm:$0xff] }
  0x23   : > { %820 = vmatpush.bf16.msra.mxu0 %v627_v6  ;;  %839 = vmatpush.bf16.msra.mxu1 %v630_v7  ;;  %v660_v53 = vsel %vm601_vm0, %v555_v49, 0  ;;  %v534_v63 = vpack.c.bf16 %v494_v61, %v474_v60  ;;  %v495_v1 = vld [vmem:[%s2709_s24 + $0x98] sm:$0xff] }
  0x24   : > { %v535_v2 = vpack.c.bf16 %v495_v1, %v475_v0 }
  0x25   : > { %858 = vmatpush.bf16.msra.mxu2 %v633_v8  ;;  %877 = vmatpush.bf16.msra.mxu3 %v636_v12 }
  0x27   : > { %821 = vmatpush.bf16.msra.mxu0 %v524_v13  ;;  %840 = vmatpush.bf16.msra.mxu1 %v525_v14 }
  0x29   : > { %859 = vmatpush.bf16.msra.mxu2 %v526_v15  ;;  %878 = vmatpush.bf16.msra.mxu3 %v527_v16 }
  0x2a   : > { %2460 = vmatmul.msk.bf16.gmra.mxu0 %vm594_vm1, %v2768_v56  ;;  %2462 = vmatmul.msk.bf16.gmra.mxu1 %vm594_vm1, %v2768_v56 }
  0x2c   : > { %2464 = vmatmul.msk.bf16.gmra.mxu2 %vm594_vm1, %v2768_v56  ;;  %2466 = vmatmul.msk.bf16.gmra.mxu3 %vm594_vm1, %v2768_v56 }
  0x3a   : > { %2467 = vmatmul.msk.bf16.vlgmr.msrb.gmra.mxu0 %vm594_vm1, %v2737_v35  ;;  %2469 = vmatmul.msk.bf16.vlgmr.msrb.gmra.mxu1 %vm594_vm1, %v2737_v35 }
  0x3b   : > { %896 = vmatpush.bf16.msrb.mxu0 %v639_v30  ;;  %915 = vmatpush.bf16.msrb.mxu1 %v642_v31 }
  0x3c   : > { %2471 = vmatmul.msk.bf16.vlgmr.msrb.gmra.mxu2 %vm594_vm1, %v2737_v35  ;;  %2473 = vmatmul.msk.bf16.vlgmr.msrb.gmra.mxu3 %vm594_vm1, %v2737_v35 }
  0x3d   : > { %934 = vmatpush.bf16.msrb.mxu2 %v645_v32  ;;  %953 = vmatpush.bf16.msrb.mxu3 %v648_v37 }
  0x3f   : > { %897 = vmatpush.bf16.msrb.mxu0 %v528_v38  ;;  %916 = vmatpush.bf16.msrb.mxu1 %v529_v39 }
  0x41   : > { %935 = vmatpush.bf16.msrb.mxu2 %v530_v40  ;;  %954 = vmatpush.bf16.msrb.mxu3 %v531_v41 }
  0x4a   : > { %2468 = vmatmul.msk.bf16.gmra.mxu0 %vm594_vm1, %v2768_v56  ;;  %2470 = vmatmul.msk.bf16.gmra.mxu1 %vm594_vm1, %v2768_v56 }
  0x4c   : > { %2472 = vmatmul.msk.bf16.gmra.mxu2 %vm594_vm1, %v2768_v56  ;;  %2474 = vmatmul.msk.bf16.gmra.mxu3 %vm594_vm1, %v2768_v56 }
  0x5a   : > { %2475 = vmatmul.msk.bf16.vlgmr.msra.gmra.mxu0 %vm594_vm1, %v2737_v35  ;;  %2477 = vmatmul.msk.bf16.vlgmr.msra.gmra.mxu1 %vm594_vm1, %v2737_v35 }
  0x5b   : > { %972 = vmatpush.bf16.msra.mxu0 %v651_v50  ;;  %991 = vmatpush.bf16.msra.mxu1 %v654_v51 }
  0x5c   : > { %2479 = vmatmul.msk.bf16.vlgmr.msra.gmra.mxu2 %vm594_vm1, %v2737_v35  ;;  %2481 = vmatmul.msk.bf16.vlgmr.msra.gmra.mxu3 %vm594_vm1, %v2737_v35 }
  0x5d   : > { %1010 = vmatpush.bf16.msra.mxu2 %v657_v52  ;;  %1029 = vmatpush.bf16.msra.mxu3 %v660_v53 }
  0x5f   : > { %973 = vmatpush.bf16.msra.mxu0 %v532_v58  ;;  %992 = vmatpush.bf16.msra.mxu1 %v533_v62 }
  0x61   : > { %1011 = vmatpush.bf16.msra.mxu2 %v534_v63  ;;  %1030 = vmatpush.bf16.msra.mxu3 %v535_v2 }
  0x6a   : > { %2476 = vmatmul.msk.bf16.gmra.mxu0 %vm594_vm1, %v2768_v56  ;;  %2478 = vmatmul.msk.bf16.gmra.mxu1 %vm594_vm1, %v2768_v56 }
  0x6c   : > { %2480 = vmatmul.msk.bf16.gmra.mxu2 %vm594_vm1, %v2768_v56  ;;  %2482 = vmatmul.msk.bf16.gmra.mxu3 %vm594_vm1, %v2768_v56 }
  0x7a   : > { %2483 = vmatmul.msk.bf16.vlgmr.msrb.gmra.mxu0 %vm594_vm1, %v2737_v35  ;;  %2485 = vmatmul.msk.bf16.vlgmr.msrb.gmra.mxu1 %vm594_vm1, %v2737_v35 }
  0x7c   : > { %2487 = vmatmul.msk.bf16.vlgmr.msrb.gmra.mxu2 %vm594_vm1, %v2737_v35  ;;  %2489 = vmatmul.msk.bf16.vlgmr.msrb.gmra.mxu3 %vm594_vm1, %v2737_v35 }
  0x7f   : > { %v2882_v9 = vpop.permute.xlu0 %576 }
  0x80   : > { %v2884_v10 = vpop.permute.xlu1 %566 }
  0x88   : > { %v2896_v15 = vpop.permute.xlu1 %571 }
  0x8a   : > { %2484 = vmatmul.msk.bf16.gmra.mxu0 %vm594_vm1, %v2768_v56  ;;  %2486 = vmatmul.msk.bf16.gmra.mxu1 %vm594_vm1, %v2768_v56 }
  0x8c   : > { %2488 = vmatmul.msk.bf16.gmra.mxu2 %vm594_vm1, %v2768_v56  ;;  %2490 = vmatmul.msk.bf16.gmra.mxu3 %vm594_vm1, %v2768_v56 }
  0x97   : > { %v671_v3 = vpop.f32.mrf.mxu0  ;;  %v690_v4 = vpop.f32.mrf.mxu1 }
  0x98   : > { %v672_v22 = vadd.f32 %v671_v3, %v2884_v10  ;;  %v691_v23 = vadd.f32 %v690_v4, %v2884_v10 }
  0x9a   : > { %2491 = vmatmul.msk.bf16.vlgmr.msra.gmra.mxu0 %vm594_vm1, %v2737_v35  ;;  %2493 = vmatmul.msk.bf16.vlgmr.msra.gmra.mxu1 %vm594_vm1, %v2737_v35  ;;  %v1042_v31 = vmax.f32 %v672_v22, 0.0  ;;  %v1043_v32 = vmax.f32 %v691_v23, 0.0 }
  0x9c   : > { %2495 = vmatmul.msk.bf16.vlgmr.msra.gmra.mxu2 %vm594_vm1, %v2737_v35  ;;  %2497 = vmatmul.msk.bf16.vlgmr.msra.gmra.mxu3 %vm594_vm1, %v2737_v35  ;;  %v2894_v35 = vpop.permute.xlu0 %581 }
  0x9f   : > { %v709_v5 = vpop.f32.mrf.mxu2  ;;  %v728_v6 = vpop.f32.mrf.mxu3 }
  0xa0   : > { %v673_v7 = vpop.f32.mrf.mxu0  ;;  %v692_v8 = vpop.f32.mrf.mxu1  ;;  %v710_v48 = vadd.f32 %v709_v5, %v2884_v10  ;;  %v729_v49 = vadd.f32 %v728_v6, %v2884_v10 }
  0xa1   : > { %v674_v25 = vadd.f32 %v673_v7, %v2896_v15  ;;  %v693_v26 = vadd.f32 %v692_v8, %v2896_v15 }
  0xa2   : > { %v1044_v62 = vmax.f32 %v710_v48, 0.0  ;;  %v1045_v63 = vmax.f32 %v729_v49, 0.0 }
  0xa3   : > { %v1062_v36 = vmax.f32 %v674_v25, 0.0  ;;  %v1063_v37 = vmax.f32 %v693_v26, 0.0 }
  0xa5   : > { %v1126_v50 = vpack.c.bf16 %v1062_v36, %v1042_v31  ;;  %v1127_v51 = vpack.c.bf16 %v1063_v37, %v1043_v32 }
  0xa7   : > { %v711_v11 = vpop.f32.mrf.mxu2  ;;  %v730_v12 = vpop.f32.mrf.mxu3 }
  0xa8   : > { %v676_v13 = vpop.f32.mrf.mxu0  ;;  %v695_v14 = vpop.f32.mrf.mxu1  ;;  %v712_v42 = vadd.f32 %v711_v11, %v2896_v15  ;;  %v731_v43 = vadd.f32 %v730_v12, %v2896_v15  ;;  %v2930_v12 = vld [vmem:[%s3420_s5 + $0x8] sm:$0xff] }
  0xa9   : > { %v677_v16 = vadd.f32 %v676_v13, %v2882_v9  ;;  %v696_v17 = vadd.f32 %v695_v14, %v2882_v9 }
  0xaa   : > { %2492 = vmatmul.msk.bf16.gmra.mxu0 %vm594_vm1, %v2768_v56  ;;  %2494 = vmatmul.msk.bf16.gmra.mxu1 %vm594_vm1, %v2768_v56  ;;  %v1064_v58 = vmax.f32 %v712_v42, 0.0  ;;  %v1065_v59 = vmax.f32 %v731_v43, 0.0 }
  0xab   : > { %v1082_v27 = vmax.f32 %v677_v16, 0.0  ;;  %v1083_v28 = vmax.f32 %v696_v17, 0.0 }
  0xac   : > { %2496 = vmatmul.msk.bf16.gmra.mxu2 %vm594_vm1, %v2768_v56  ;;  %2498 = vmatmul.msk.bf16.gmra.mxu3 %vm594_vm1, %v2768_v56  ;;  %v1128_v4 = vpack.c.bf16 %v1064_v58, %v1044_v62  ;;  %v1129_v5 = vpack.c.bf16 %v1065_v59, %v1045_v63 }
  0xaf   : > { %v714_v18 = vpop.f32.mrf.mxu2  ;;  %v733_v19 = vpop.f32.mrf.mxu3 }
  0xb0   : > { %v678_v20 = vpop.f32.mrf.mxu0  ;;  %v697_v21 = vpop.f32.mrf.mxu1  ;;  %v715_v38 = vadd.f32 %v714_v18, %v2882_v9  ;;  %v734_v39 = vadd.f32 %v733_v19, %v2882_v9 }
  0xb1   : > { %v679_v24 = vadd.f32 %v678_v20, %v2894_v35  ;;  %v698_v56 = vadd.f32 %v697_v21, %v2894_v35 }
  0xb2   : > { %v1084_v52 = vmax.f32 %v715_v38, 0.0  ;;  %v1085_v53 = vmax.f32 %v734_v39, 0.0 }
  0xb3   : > { %v1102_v29 = vmax.f32 %v679_v24, 0.0  ;;  %v1103_v30 = vmax.f32 %v698_v56, 0.0  ;;  %v1168_v24 = vld [vmem:[%s3421_s6 + $0x10] sm:$0xff] }
  0xb4   : > { %1182 = vperm.xlu2 %2588, %v1168_v24  }
  0xb5   : > { %v1146_v33 = vpack.c.bf16 %v1102_v29, %v1082_v27  ;;  %v1147_v34 = vpack.c.bf16 %v1103_v30, %v1083_v28 }
  0xb7   : > { %v716_v40 = vpop.f32.mrf.mxu2  ;;  %v735_v41 = vpop.f32.mrf.mxu3  ;;  %1213 = vmatpush.bf16.msrb.mxu0 %v1146_v33  ;;  %1232 = vmatpush.bf16.msrb.mxu1 %v1147_v34 }
  0xb8   : > { %v717_v44 = vadd.f32 %v716_v40, %v2894_v35  ;;  %v736_v45 = vadd.f32 %v735_v41, %v2894_v35  ;;  %v747_v46 = vpop.f32.mrf.mxu0  ;;  %v766_v47 = vpop.f32.mrf.mxu1 }
  0xb9   : > { %v748_v56 = vadd.f32 %v747_v46, %v2884_v10  ;;  %v767_v25 = vadd.f32 %v766_v47, %v2884_v10 }
  0xba   : > { %v1104_v54 = vmax.f32 %v717_v44, 0.0  ;;  %v1105_v55 = vmax.f32 %v736_v45, 0.0 }
  0xbb   : > { %1214 = vmatpush.bf16.msrb.mxu0 %v1126_v50  ;;  %1233 = vmatpush.bf16.msrb.mxu1 %v1127_v51  ;;  %v1046_v37 = vmax.f32 %v748_v56, 0.0  ;;  %v1047_v38 = vmax.f32 %v767_v25, 0.0  ;;  %v1169_v51 = vld [vmem:[%s3421_s6 + $0x18] sm:$0xff] }
  0xbc   : > { %v1148_v60 = vpack.c.bf16 %v1104_v54, %v1084_v52  ;;  %v1149_v61 = vpack.c.bf16 %v1105_v55, %v1085_v53  ;;  %1187 = vperm.xlu2 %2588, %v1169_v51  }
  0xbe   : > { %1251 = vmatpush.bf16.msrb.mxu2 %v1148_v60  ;;  %1270 = vmatpush.bf16.msrb.mxu3 %v1149_v61 }
  0xbf   : > { %v785_v0 = vpop.f32.mrf.mxu2  ;;  %v804_v1 = vpop.f32.mrf.mxu3  ;;  %2507 = vmatmul.msk.bf16.vlgmr.msrb.gmra.mxu0 %vm1200_vm2, %v2917_v57  ;;  %2509 = vmatmul.msk.bf16.vlgmr.msrb.gmra.mxu1 %vm1200_vm2, %v2917_v57 }
  0xc0   : > { %v749_v2 = vpop.f32.mrf.mxu0  ;;  %v768_v3 = vpop.f32.mrf.mxu1  ;;  %v786_v47 = vadd.f32 %v785_v0, %v2884_v10  ;;  %v805_v48 = vadd.f32 %v804_v1, %v2884_v10 }
  0xc1   : > { %v750_v20 = vadd.f32 %v749_v2, %v2896_v15  ;;  %v769_v21 = vadd.f32 %v768_v3, %v2896_v15 }
  0xc2   : > { %1252 = vmatpush.bf16.msrb.mxu2 %v1128_v4  ;;  %1271 = vmatpush.bf16.msrb.mxu3 %v1129_v5  ;;  %v1048_v62 = vmax.f32 %v786_v47, 0.0  ;;  %v1049_v63 = vmax.f32 %v805_v48, 0.0 }
  0xc3   : > { %v1066_v30 = vmax.f32 %v750_v20, 0.0  ;;  %v1067_v31 = vmax.f32 %v769_v21, 0.0 }
  0xc5   : > { %2511 = vmatmul.msk.bf16.vlgmr.msrb.gmra.mxu2 %vm1200_vm2, %v2917_v57  ;;  %2513 = vmatmul.msk.bf16.vlgmr.msrb.gmra.mxu3 %vm1200_vm2, %v2917_v57  ;;  %v1130_v49 = vpack.c.bf16 %v1066_v30, %v1046_v37  ;;  %v1131_v50 = vpack.c.bf16 %v1067_v31, %v1047_v38 }
  0xc7   : > { %v787_v6 = vpop.f32.mrf.mxu2  ;;  %v806_v7 = vpop.f32.mrf.mxu3 }
  0xc8   : > { %v752_v8 = vpop.f32.mrf.mxu0  ;;  %v771_v11 = vpop.f32.mrf.mxu1  ;;  %v788_v41 = vadd.f32 %v787_v6, %v2896_v15  ;;  %v807_v42 = vadd.f32 %v806_v7, %v2896_v15 }
  0xc9   : > { %v753_v13 = vadd.f32 %v752_v8, %v2882_v9  ;;  %v772_v14 = vadd.f32 %v771_v11, %v2882_v9 }
  0xca   : > { %v1068_v58 = vmax.f32 %v788_v41, 0.0  ;;  %v1069_v59 = vmax.f32 %v807_v42, 0.0 }
  0xcb   : > { %v1086_v26 = vmax.f32 %v753_v13, 0.0  ;;  %v1087_v27 = vmax.f32 %v772_v14, 0.0 }
  0xcc   : > { %v1132_v4 = vpack.c.bf16 %v1068_v58, %v1048_v62  ;;  %v1133_v5 = vpack.c.bf16 %v1069_v59, %v1049_v63 }
  0xcf   : > { %v790_v16 = vpop.f32.mrf.mxu2  ;;  %v809_v17 = vpop.f32.mrf.mxu3  ;;  %2508 = vmatmul.msk.bf16.gmra.mxu0 %vm1200_vm2, %v2930_v12  ;;  %2510 = vmatmul.msk.bf16.gmra.mxu1 %vm1200_vm2, %v2930_v12 }
  0xd0   : > { %v754_v18 = vpop.f32.mrf.mxu0  ;;  %v773_v19 = vpop.f32.mrf.mxu1  ;;  %v791_v34 = vadd.f32 %v790_v16, %v2882_v9  ;;  %v810_v36 = vadd.f32 %v809_v17, %v2882_v9 }
  0xd1   : > { %v755_v22 = vadd.f32 %v754_v18, %v2894_v35  ;;  %v774_v23 = vadd.f32 %v773_v19, %v2894_v35 }
  0xd2   : > { %v1088_v52 = vmax.f32 %v791_v34, 0.0  ;;  %v1089_v53 = vmax.f32 %v810_v36, 0.0 }
  0xd3   : > { %v1106_v28 = vmax.f32 %v755_v22, 0.0  ;;  %v1107_v29 = vmax.f32 %v774_v23, 0.0 }
  0xd5   : > { %v1150_v32 = vpack.c.bf16 %v1106_v28, %v1086_v26  ;;  %v1151_v33 = vpack.c.bf16 %v1107_v29, %v1087_v27  ;;  %2512 = vmatmul.msk.bf16.gmra.mxu2 %vm1200_vm2, %v2930_v12  ;;  %2514 = vmatmul.msk.bf16.gmra.mxu3 %vm1200_vm2, %v2930_v12 }
  0xd7   : > { %v792_v39 = vpop.f32.mrf.mxu2  ;;  %v811_v40 = vpop.f32.mrf.mxu3  ;;  %1289 = vmatpush.bf16.msra.mxu0 %v1150_v32  ;;  %1308 = vmatpush.bf16.msra.mxu1 %v1151_v33 }
  0xd8   : > { %v793_v43 = vadd.f32 %v792_v39, %v2894_v35  ;;  %v812_v44 = vadd.f32 %v811_v40, %v2894_v35  ;;  %v823_v45 = vpop.f32.mrf.mxu0  ;;  %v842_v46 = vpop.f32.mrf.mxu1 }
  0xd9   : > { %v824_v24 = vadd.f32 %v823_v45, %v2884_v10  ;;  %v843_v56 = vadd.f32 %v842_v46, %v2884_v10 }
  0xda   : > { %v1108_v54 = vmax.f32 %v793_v43, 0.0  ;;  %v1109_v55 = vmax.f32 %v812_v44, 0.0 }
  0xdb   : > { %1290 = vmatpush.bf16.msra.mxu0 %v1130_v49  ;;  %1309 = vmatpush.bf16.msra.mxu1 %v1131_v50  ;;  %v1050_v36 = vmax.f32 %v824_v24, 0.0  ;;  %v1051_v37 = vmax.f32 %v843_v56, 0.0 }
  0xdc   : > { %v1152_v60 = vpack.c.bf16 %v1108_v54, %v1088_v52  ;;  %v1153_v61 = vpack.c.bf16 %v1109_v55, %v1089_v53 }
  0xde   : > { %1327 = vmatpush.bf16.msra.mxu2 %v1152_v60  ;;  %1346 = vmatpush.bf16.msra.mxu3 %v1153_v61 }
  0xdf   : > { %v861_v0 = vpop.f32.mrf.mxu2  ;;  %v880_v1 = vpop.f32.mrf.mxu3  ;;  %2515 = vmatmul.msk.bf16.vlgmr.msra.gmra.mxu0 %vm1200_vm2, %v2917_v57  ;;  %2517 = vmatmul.msk.bf16.vlgmr.msra.gmra.mxu1 %vm1200_vm2, %v2917_v57 }
  0xe0   : > { %v825_v2 = vpop.f32.mrf.mxu0  ;;  %v844_v3 = vpop.f32.mrf.mxu1  ;;  %v862_v46 = vadd.f32 %v861_v0, %v2884_v10  ;;  %v881_v47 = vadd.f32 %v880_v1, %v2884_v10 }
  0xe1   : > { %v826_v20 = vadd.f32 %v825_v2, %v2896_v15  ;;  %v845_v21 = vadd.f32 %v844_v3, %v2896_v15 }
  0xe2   : > { %1328 = vmatpush.bf16.msra.mxu2 %v1132_v4  ;;  %1347 = vmatpush.bf16.msra.mxu3 %v1133_v5  ;;  %v1052_v60 = vmax.f32 %v862_v46, 0.0  ;;  %v1053_v61 = vmax.f32 %v881_v47, 0.0 }
  0xe3   : > { %v1070_v29 = vmax.f32 %v826_v20, 0.0  ;;  %v1071_v30 = vmax.f32 %v845_v21, 0.0 }
  0xe5   : > { %2519 = vmatmul.msk.bf16.vlgmr.msra.gmra.mxu2 %vm1200_vm2, %v2917_v57  ;;  %2521 = vmatmul.msk.bf16.vlgmr.msra.gmra.mxu3 %vm1200_vm2, %v2917_v57  ;;  %v1134_v48 = vpack.c.bf16 %v1070_v29, %v1050_v36  ;;  %v1135_v49 = vpack.c.bf16 %v1071_v30, %v1051_v37 }
  0xe7   : > { %v863_v6 = vpop.f32.mrf.mxu2  ;;  %v882_v7 = vpop.f32.mrf.mxu3 }
  0xe8   : > { %v828_v8 = vpop.f32.mrf.mxu0  ;;  %v847_v11 = vpop.f32.mrf.mxu1  ;;  %v864_v40 = vadd.f32 %v863_v6, %v2896_v15  ;;  %v883_v41 = vadd.f32 %v882_v7, %v2896_v15 }
  0xe9   : > { %v829_v13 = vadd.f32 %v828_v8, %v2882_v9  ;;  %v848_v14 = vadd.f32 %v847_v11, %v2882_v9 }
  0xea   : > { %v1072_v54 = vmax.f32 %v864_v40, 0.0  ;;  %v1073_v55 = vmax.f32 %v883_v41, 0.0 }
  0xeb   : > { %v1090_v25 = vmax.f32 %v829_v13, 0.0  ;;  %v1091_v26 = vmax.f32 %v848_v14, 0.0 }
  0xec   : > { %v1136_v2 = vpack.c.bf16 %v1072_v54, %v1052_v60  ;;  %v1137_v3 = vpack.c.bf16 %v1073_v55, %v1053_v61 }
  0xef   : > { %v866_v16 = vpop.f32.mrf.mxu2  ;;  %v885_v17 = vpop.f32.mrf.mxu3  ;;  %2516 = vmatmul.msk.bf16.gmra.mxu0 %vm1200_vm2, %v2930_v12  ;;  %2518 = vmatmul.msk.bf16.gmra.mxu1 %vm1200_vm2, %v2930_v12 }
  0xf0   : > { %v830_v18 = vpop.f32.mrf.mxu0  ;;  %v849_v19 = vpop.f32.mrf.mxu1  ;;  %v867_v33 = vadd.f32 %v866_v16, %v2882_v9  ;;  %v886_v34 = vadd.f32 %v885_v17, %v2882_v9 }
  0xf1   : > { %v831_v22 = vadd.f32 %v830_v18, %v2894_v35  ;;  %v850_v23 = vadd.f32 %v849_v19, %v2894_v35 }
  0xf2   : > { %v1092_v50 = vmax.f32 %v867_v33, 0.0  ;;  %v1093_v51 = vmax.f32 %v886_v34, 0.0 }
  0xf3   : > { %v1110_v27 = vmax.f32 %v831_v22, 0.0  ;;  %v1111_v28 = vmax.f32 %v850_v23, 0.0 }
  0xf5   : > { %v1154_v31 = vpack.c.bf16 %v1110_v27, %v1090_v25  ;;  %v1155_v32 = vpack.c.bf16 %v1111_v28, %v1091_v26  ;;  %2520 = vmatmul.msk.bf16.gmra.mxu2 %vm1200_vm2, %v2930_v12  ;;  %2522 = vmatmul.msk.bf16.gmra.mxu3 %vm1200_vm2, %v2930_v12 }
  0xf7   : > { %v868_v38 = vpop.f32.mrf.mxu2  ;;  %v887_v39 = vpop.f32.mrf.mxu3  ;;  %1365 = vmatpush.bf16.msrb.mxu0 %v1154_v31  ;;  %1384 = vmatpush.bf16.msrb.mxu1 %v1155_v32 }
  0xf8   : > { %v869_v42 = vadd.f32 %v868_v38, %v2894_v35  ;;  %v888_v43 = vadd.f32 %v887_v39, %v2894_v35  ;;  %v899_v44 = vpop.f32.mrf.mxu0  ;;  %v918_v45 = vpop.f32.mrf.mxu1 }
  0xf9   : > { %v900_v22 = vadd.f32 %v899_v44, %v2884_v10  ;;  %v919_v23 = vadd.f32 %v918_v45, %v2884_v10 }
  0xfa   : > { %v1112_v52 = vmax.f32 %v869_v42, 0.0  ;;  %v1113_v53 = vmax.f32 %v888_v43, 0.0 }
  0xfb   : > { %1366 = vmatpush.bf16.msrb.mxu0 %v1134_v48  ;;  %1385 = vmatpush.bf16.msrb.mxu1 %v1135_v49  ;;  %v1054_v33 = vmax.f32 %v900_v22, 0.0  ;;  %v1055_v34 = vmax.f32 %v919_v23, 0.0 }
  0xfc   : > { %v1156_v58 = vpack.c.bf16 %v1112_v52, %v1092_v50  ;;  %v1157_v59 = vpack.c.bf16 %v1113_v53, %v1093_v51 }
  0xfe   : > { %1403 = vmatpush.bf16.msrb.mxu2 %v1156_v58  ;;  %1422 = vmatpush.bf16.msrb.mxu3 %v1157_v59  ;;  %v1708_v58 = vld [vmem:[%s3423_s8] sm:$0xff] }
  0xff   : > { %v937_v62 = vpop.f32.mrf.mxu2  ;;  %v956_v63 = vpop.f32.mrf.mxu3  ;;  %2523 = vmatmul.msk.bf16.vlgmr.msrb.gmra.mxu0 %vm1200_vm2, %v2917_v57  ;;  %2525 = vmatmul.msk.bf16.vlgmr.msrb.gmra.mxu1 %vm1200_vm2, %v2917_v57 }
 0x100   : > { %v901_v0 = vpop.f32.mrf.mxu0  ;;  %v920_v1 = vpop.f32.mrf.mxu1  ;;  %v938_v44 = vadd.f32 %v937_v62, %v2884_v10  ;;  %v957_v45 = vadd.f32 %v956_v63, %v2884_v10  ;;  %1711 = vperm.xlu2 %2588, %v1708_v58  }
 0x101   : > { %v902_v18 = vadd.f32 %v901_v0, %v2896_v15  ;;  %v921_v19 = vadd.f32 %v920_v1, %v2896_v15 }
 0x102   : > { %1404 = vmatpush.bf16.msrb.mxu2 %v1136_v2  ;;  %1423 = vmatpush.bf16.msrb.mxu3 %v1137_v3  ;;  %v1056_v59 = vmax.f32 %v938_v44, 0.0  ;;  %v1057_v60 = vmax.f32 %v957_v45, 0.0 }
 0x103   : > { %v1074_v27 = vmax.f32 %v902_v18, 0.0  ;;  %v1075_v28 = vmax.f32 %v921_v19, 0.0 }
 0x105   : > { %2527 = vmatmul.msk.bf16.vlgmr.msrb.gmra.mxu2 %vm1200_vm2, %v2917_v57  ;;  %2529 = vmatmul.msk.bf16.vlgmr.msrb.gmra.mxu3 %vm1200_vm2, %v2917_v57  ;;  %v1138_v46 = vpack.c.bf16 %v1074_v27, %v1054_v33  ;;  %v1139_v47 = vpack.c.bf16 %v1075_v28, %v1055_v34 }
 0x107   : > { %v939_v4 = vpop.f32.mrf.mxu2  ;;  %v958_v5 = vpop.f32.mrf.mxu3 }
 0x108   : > { %v904_v6 = vpop.f32.mrf.mxu0  ;;  %v923_v7 = vpop.f32.mrf.mxu1  ;;  %v940_v38 = vadd.f32 %v939_v4, %v2896_v15  ;;  %v959_v39 = vadd.f32 %v958_v5, %v2896_v15 }
 0x109   : > { %v905_v8 = vadd.f32 %v904_v6, %v2882_v9  ;;  %v924_v11 = vadd.f32 %v923_v7, %v2882_v9 }
 0x10a   : > { %v1076_v52 = vmax.f32 %v940_v38, 0.0  ;;  %v1077_v53 = vmax.f32 %v959_v39, 0.0 }
 0x10b   : > { %v1094_v24 = vmax.f32 %v905_v8, 0.0  ;;  %v1095_v56 = vmax.f32 %v924_v11, 0.0 }
 0x10c   : > { %v1140_v1 = vpack.c.bf16 %v1076_v52, %v1056_v59  ;;  %v1141_v2 = vpack.c.bf16 %v1077_v53, %v1057_v60 }
 0x10e   : > { %v3069_v59 = vpop.permute.xlu2 %1182 }
 0x10f   : > { %v942_v13 = vpop.f32.mrf.mxu2  ;;  %v961_v14 = vpop.f32.mrf.mxu3  ;;  %2524 = vmatmul.msk.bf16.gmra.mxu0 %vm1200_vm2, %v2930_v12  ;;  %2526 = vmatmul.msk.bf16.gmra.mxu1 %vm1200_vm2, %v2930_v12 }
 0x110   : > { %v906_v16 = vpop.f32.mrf.mxu0  ;;  %v925_v17 = vpop.f32.mrf.mxu1  ;;  %v943_v31 = vadd.f32 %v942_v13, %v2882_v9  ;;  %v962_v32 = vadd.f32 %v961_v14, %v2882_v9 }
 0x111   : > { %v907_v20 = vadd.f32 %v906_v16, %v2894_v35  ;;  %v926_v21 = vadd.f32 %v925_v17, %v2894_v35 }
 0x112   : > { %v1096_v48 = vmax.f32 %v943_v31, 0.0  ;;  %v1097_v49 = vmax.f32 %v962_v32, 0.0 }
 0x113   : > { %v1114_v25 = vmax.f32 %v907_v20, 0.0  ;;  %v1115_v26 = vmax.f32 %v926_v21, 0.0 }
 0x115   : > { %v1158_v29 = vpack.c.bf16 %v1114_v25, %v1094_v24  ;;  %v1159_v30 = vpack.c.bf16 %v1115_v26, %v1095_v56  ;;  %2528 = vmatmul.msk.bf16.gmra.mxu2 %vm1200_vm2, %v2930_v12  ;;  %2530 = vmatmul.msk.bf16.gmra.mxu3 %vm1200_vm2, %v2930_v12 }
 0x117   : > { %v944_v36 = vpop.f32.mrf.mxu2  ;;  %v963_v37 = vpop.f32.mrf.mxu3  ;;  %1441 = vmatpush.bf16.msra.mxu0 %v1158_v29  ;;  %1460 = vmatpush.bf16.msra.mxu1 %v1159_v30 }
 0x118   : > { %v945_v40 = vadd.f32 %v944_v36, %v2894_v35  ;;  %v964_v41 = vadd.f32 %v963_v37, %v2894_v35  ;;  %v975_v42 = vpop.f32.mrf.mxu0  ;;  %v994_v43 = vpop.f32.mrf.mxu1 }
 0x119   : > { %v976_v21 = vadd.f32 %v975_v42, %v2884_v10  ;;  %v995_v22 = vadd.f32 %v994_v43, %v2884_v10 }
 0x11a   : > { %v1116_v50 = vmax.f32 %v945_v40, 0.0  ;;  %v1117_v51 = vmax.f32 %v964_v41, 0.0 }
 0x11b   : > { %1442 = vmatpush.bf16.msra.mxu0 %v1138_v46  ;;  %1461 = vmatpush.bf16.msra.mxu1 %v1139_v47  ;;  %v1058_v32 = vmax.f32 %v976_v21, 0.0  ;;  %v1059_v33 = vmax.f32 %v995_v22, 0.0 }
 0x11c   : > { %v1160_v54 = vpack.c.bf16 %v1116_v50, %v1096_v48  ;;  %v1161_v55 = vpack.c.bf16 %v1117_v51, %v1097_v49 }
 0x11e   : > { %1479 = vmatpush.bf16.msra.mxu2 %v1160_v54  ;;  %1498 = vmatpush.bf16.msra.mxu3 %v1161_v55 }
 0x11f   : > { %v1013_v61 = vpop.f32.mrf.mxu2  ;;  %v1032_v62 = vpop.f32.mrf.mxu3  ;;  %2531 = vmatmul.msk.bf16.vlgmr.msra.gmra.mxu0 %vm1200_vm2, %v2917_v57  ;;  %2533 = vmatmul.msk.bf16.vlgmr.msra.gmra.mxu1 %vm1200_vm2, %v2917_v57 }
 0x120   : > { %v977_v63 = vpop.f32.mrf.mxu0  ;;  %v996_v0 = vpop.f32.mrf.mxu1  ;;  %v1014_v41 = vadd.f32 %v1013_v61, %v2884_v10  ;;  %v1033_v42 = vadd.f32 %v1032_v62, %v2884_v10 }
 0x121   : > { %v978_v17 = vadd.f32 %v977_v63, %v2896_v15  ;;  %v997_v18 = vadd.f32 %v996_v0, %v2896_v15 }
 0x122   : > { %1480 = vmatpush.bf16.msra.mxu2 %v1140_v1  ;;  %1499 = vmatpush.bf16.msra.mxu3 %v1141_v2  ;;  %v1060_v53 = vmax.f32 %v1014_v41, 0.0 }
 0x123   : > { %v1078_v26 = vmax.f32 %v978_v17, 0.0  ;;  %v1079_v27 = vmax.f32 %v997_v18, 0.0  ;;  %v3089_v17 = vpop.permute.xlu0 %1172 }
 0x125   : > { %2535 = vmatmul.msk.bf16.vlgmr.msra.gmra.mxu2 %vm1200_vm2, %v2917_v57  ;;  %2537 = vmatmul.msk.bf16.vlgmr.msra.gmra.mxu3 %vm1200_vm2, %v2917_v57  ;;  %v1142_v43 = vpack.c.bf16 %v1078_v26, %v1058_v32 }
 0x127   : > { %v1015_v3 = vpop.f32.mrf.mxu2  ;;  %v1034_v4 = vpop.f32.mrf.mxu3 }
 0x128   : > { %v980_v5 = vpop.f32.mrf.mxu0  ;;  %v999_v6 = vpop.f32.mrf.mxu1  ;;  %v1016_v37 = vadd.f32 %v1015_v3, %v2896_v15  ;;  %v1035_v38 = vadd.f32 %v1034_v4, %v2896_v15 }
 0x129   : > { %v981_v7 = vadd.f32 %v980_v5, %v2882_v9  ;;  %v1000_v8 = vadd.f32 %v999_v6, %v2882_v9  ;;  %v3077_v4 = vpop.permute.xlu2 %1187 }
 0x12a   : > { %v1080_v48 = vmax.f32 %v1016_v37, 0.0  ;;  %v1081_v49 = vmax.f32 %v1035_v38, 0.0 }
 0x12b   : > { %v1098_v23 = vmax.f32 %v981_v7, 0.0  ;;  %v1099_v24 = vmax.f32 %v1000_v8, 0.0 }
 0x12c   : > { %v1144_v10 = vpack.c.bf16 %v1080_v48, %v1060_v53 }
 0x12f   : > { %v1018_v11 = vpop.f32.mrf.mxu2  ;;  %v1037_v13 = vpop.f32.mrf.mxu3  ;;  %2532 = vmatmul.msk.bf16.gmra.mxu0 %vm1200_vm2, %v2930_v12  ;;  %2534 = vmatmul.msk.bf16.gmra.mxu1 %vm1200_vm2, %v2930_v12 }
 0x130   : > { %v982_v14 = vpop.f32.mrf.mxu0  ;;  %v1001_v16 = vpop.f32.mrf.mxu1  ;;  %v1019_v30 = vadd.f32 %v1018_v11, %v2882_v9  ;;  %v1038_v31 = vadd.f32 %v1037_v13, %v2882_v9  ;;  %v1143_v9 = vpack.c.bf16 %v1079_v27, %v1059_v33 }
 0x131   : > { %v983_v19 = vadd.f32 %v982_v14, %v2894_v35  ;;  %v1002_v20 = vadd.f32 %v1001_v16, %v2894_v35 }
 0x132   : > { %v1100_v44 = vmax.f32 %v1019_v30, 0.0  ;;  %v1101_v45 = vmax.f32 %v1038_v31, 0.0 }
 0x133   : > { %v1118_v56 = vmax.f32 %v983_v19, 0.0  ;;  %v1119_v25 = vmax.f32 %v1002_v20, 0.0 }
 0x135   : > { %v1162_v28 = vpack.c.bf16 %v1118_v56, %v1098_v23  ;;  %v1163_v29 = vpack.c.bf16 %v1119_v25, %v1099_v24  ;;  %2536 = vmatmul.msk.bf16.gmra.mxu2 %vm1200_vm2, %v2930_v12  ;;  %2538 = vmatmul.msk.bf16.gmra.mxu3 %vm1200_vm2, %v2930_v12 }
 0x137   : > { %v1020_v34 = vpop.f32.mrf.mxu2  ;;  %v1039_v36 = vpop.f32.mrf.mxu3  ;;  %1517 = vmatpush.bf16.msrb.mxu0 %v1162_v28  ;;  %1536 = vmatpush.bf16.msrb.mxu1 %v1163_v29 }
 0x138   : > { %v1021_v39 = vadd.f32 %v1020_v34, %v2894_v35  ;;  %v1040_v40 = vadd.f32 %v1039_v36, %v2894_v35  ;;  %v1061_v35 = vmax.f32 %v1033_v42, 0.0  ;;  %v3098_v34 = vld [vmem:[%s3422_s7] sm:$0xf] }
 0x13a   : > { %v1120_v46 = vmax.f32 %v1021_v39, 0.0  ;;  %v1121_v47 = vmax.f32 %v1040_v40, 0.0  ;;  %v1145_v54 = vpack.c.bf16 %v1081_v49, %v1061_v35 }
 0x13b   : > { %1518 = vmatpush.bf16.msrb.mxu0 %v1142_v43  ;;  %1537 = vmatpush.bf16.msrb.mxu1 %v1143_v9 }
 0x13c   : > { %v1164_v50 = vpack.c.bf16 %v1120_v46, %v1100_v44  ;;  %v1165_v15 = vpack.c.bf16 %v1121_v47, %v1101_v45  ;;  %v1216_v51 = vpop.f32.mrf.mxu0  ;;  %v1235_v52 = vpop.f32.mrf.mxu1 }
 0x13d   : > { %v1217_v18 = vadd.f32 %v1216_v51, %v3089_v17  ;;  %v1236_v19 = vadd.f32 %v1235_v52, %v3089_v17 }
 0x13e   : > { %1555 = vmatpush.bf16.msrb.mxu2 %v1164_v50  ;;  %1574 = vmatpush.bf16.msrb.mxu3 %v1165_v15 }
 0x13f   : > { %2539 = vmatmul.msk.bf16.vlgmr.msrb.gmra.mxu0 %vm1200_vm2, %v2917_v57  ;;  %2541 = vmatmul.msk.bf16.vlgmr.msrb.gmra.mxu1 %vm1200_vm2, %v2917_v57  ;;  %v1587_v27 = vmax.f32 %v1217_v18, 0.0  ;;  %v1588_v28 = vmax.f32 %v1236_v19, 0.0 }
 0x142   : > { %1556 = vmatpush.bf16.msrb.mxu2 %v1144_v10  ;;  %1575 = vmatpush.bf16.msrb.mxu3 %v1145_v54 }
 0x144   : > { %v1218_v55 = vpop.f32.mrf.mxu0  ;;  %v1237_v58 = vpop.f32.mrf.mxu1 }
 0x145   : > { %2543 = vmatmul.msk.bf16.vlgmr.msrb.gmra.mxu2 %vm1200_vm2, %v2917_v57  ;;  %2545 = vmatmul.msk.bf16.vlgmr.msrb.gmra.mxu3 %vm1200_vm2, %v2917_v57  ;;  %v3079_v57 = vpop.permute.xlu1 %1177 }
 0x146   : > { %v1219_v5 = vadd.f32 %v1218_v55, %v3079_v57  ;;  %v1238_v6 = vadd.f32 %v1237_v58, %v3079_v57 }
 0x148   : > { %v1254_v60 = vpop.f32.mrf.mxu2  ;;  %v1273_v61 = vpop.f32.mrf.mxu3  ;;  %v1607_v24 = vmax.f32 %v1219_v5, 0.0  ;;  %v1608_v56 = vmax.f32 %v1238_v6, 0.0 }
 0x149   : > { %v1255_v42 = vadd.f32 %v1254_v60, %v3089_v17  ;;  %v1274_v43 = vadd.f32 %v1273_v61, %v3089_v17 }
 0x14a   : > { %v1668_v30 = vpack.c.bf16 %v1607_v24, %v1587_v27  ;;  %v1669_v31 = vpack.c.bf16 %v1608_v56, %v1588_v28 }
 0x14b   : > { %v1589_v52 = vmax.f32 %v1255_v42, 0.0  ;;  %v1590_v53 = vmax.f32 %v1274_v43, 0.0 }
 0x14c   : > { %v1221_v62 = vpop.f32.mrf.mxu0  ;;  %v1240_v63 = vpop.f32.mrf.mxu1 }
 0x14d   : > { %v1222_v2 = vadd.f32 %v1221_v62, %v3069_v59  ;;  %v1241_v3 = vadd.f32 %v1240_v63, %v3069_v59 }
 0x14f   : > { %2540 = vmatmul.msk.bf16.gmra.mxu0 %vm1200_vm2, %v2930_v12  ;;  %2542 = vmatmul.msk.bf16.gmra.mxu1 %vm1200_vm2, %v2930_v12  ;;  %v1627_v11 = vmax.f32 %v1222_v2, 0.0  ;;  %v1628_v13 = vmax.f32 %v1241_v3, 0.0 }
 0x150   : > { %v1256_v0 = vpop.f32.mrf.mxu2  ;;  %v1275_v1 = vpop.f32.mrf.mxu3 }
 0x151   : > { %v1257_v38 = vadd.f32 %v1256_v0, %v3079_v57  ;;  %v1276_v39 = vadd.f32 %v1275_v1, %v3079_v57 }
 0x153   : > { %v1609_v49 = vmax.f32 %v1257_v38, 0.0  ;;  %v1610_v50 = vmax.f32 %v1276_v39, 0.0 }
 0x154   : > { %v1223_v7 = vpop.f32.mrf.mxu0  ;;  %v1242_v8 = vpop.f32.mrf.mxu1 }
 0x155   : > { %v1224_v14 = vadd.f32 %v1223_v7, %v3077_v4  ;;  %v1243_v16 = vadd.f32 %v1242_v8, %v3077_v4  ;;  %2544 = vmatmul.msk.bf16.gmra.mxu2 %vm1200_vm2, %v2930_v12  ;;  %2546 = vmatmul.msk.bf16.gmra.mxu3 %vm1200_vm2, %v2930_v12  ;;  %v1670_v54 = vpack.c.bf16 %v1609_v49, %v1589_v52 }
 0x156   : > { %v1671_v55 = vpack.c.bf16 %v1610_v50, %v1590_v53 }
 0x157   : > { %v1647_v20 = vmax.f32 %v1224_v14, 0.0  ;;  %v1648_v21 = vmax.f32 %v1243_v16, 0.0 }
 0x158   : > { %v1259_v22 = vpop.f32.mrf.mxu2  ;;  %v1278_v23 = vpop.f32.mrf.mxu3 }
 0x159   : > { %v1688_v25 = vpack.c.bf16 %v1647_v20, %v1627_v11  ;;  %v1689_v26 = vpack.c.bf16 %v1648_v21, %v1628_v13  ;;  %v1260_v32 = vadd.f32 %v1259_v22, %v3069_v59  ;;  %v1279_v33 = vadd.f32 %v1278_v23, %v3069_v59 }
 0x15b   : > { %1723 = vmatpush.bf16.msra.mxu0 %v1688_v25  ;;  %1736 = vmatpush.bf16.msra.mxu1 %v1689_v26  ;;  %v1629_v9 = vmax.f32 %v1260_v32, 0.0  ;;  %v1630_v44 = vmax.f32 %v1279_v33, 0.0 }
 0x15c   : > { %v1292_v29 = vpop.f32.mrf.mxu0  ;;  %v1311_v12 = vpop.f32.mrf.mxu1 }
 0x15d   : > { %v1293_v13 = vadd.f32 %v1292_v29, %v3089_v17  ;;  %v1312_v14 = vadd.f32 %v1311_v12, %v3089_v17 }
 0x15f   : > { %1724 = vmatpush.bf16.msra.mxu0 %v1668_v30  ;;  %1737 = vmatpush.bf16.msra.mxu1 %v1669_v31  ;;  %v1591_v56 = vmax.f32 %v1293_v13, 0.0  ;;  %v1592_v25 = vmax.f32 %v1312_v14, 0.0 }
 0x160   : > { %v1261_v36 = vpop.f32.mrf.mxu2  ;;  %v1280_v37 = vpop.f32.mrf.mxu3 }
 0x161   : > { %v1262_v40 = vadd.f32 %v1261_v36, %v3077_v4  ;;  %v1281_v41 = vadd.f32 %v1280_v37, %v3077_v4 }
 0x162   : > { %2547 = vmatmul.msk.bf16.vlgmr.msra.gmra.mxu0 %vm1200_vm2, %v3098_v34  ;;  %2548 = vmatmul.msk.bf16.vlgmr.msra.gmra.mxu1 %vm1200_vm2, %v3098_v34 }
 0x163   : > { %v1649_v45 = vmax.f32 %v1262_v40, 0.0  ;;  %v1650_v46 = vmax.f32 %v1281_v41, 0.0 }
 0x164   : > { %v1294_v47 = vpop.f32.mrf.mxu0  ;;  %v1313_v48 = vpop.f32.mrf.mxu1 }
 0x165   : > { %v1690_v15 = vpack.c.bf16 %v1649_v45, %v1629_v9  ;;  %v1691_v51 = vpack.c.bf16 %v1650_v46, %v1630_v44  ;;  %v1295_v1 = vadd.f32 %v1294_v47, %v3079_v57  ;;  %v1314_v2 = vadd.f32 %v1313_v48, %v3079_v57 }
 0x167   : > { %1749 = vmatpush.bf16.msra.mxu2 %v1690_v15  ;;  %1762 = vmatpush.bf16.msra.mxu3 %v1691_v51  ;;  %v1611_v21 = vmax.f32 %v1295_v1, 0.0  ;;  %v1612_v22 = vmax.f32 %v1314_v2, 0.0 }
 0x168   : > { %v1330_v35 = vpop.f32.mrf.mxu2  ;;  %v1349_v10 = vpop.f32.mrf.mxu3 }
 0x169   : > { %v1672_v28 = vpack.c.bf16 %v1611_v21, %v1591_v56  ;;  %v1673_v30 = vpack.c.bf16 %v1612_v22, %v1592_v25  ;;  %v1331_v39 = vadd.f32 %v1330_v35, %v3089_v17  ;;  %v1350_v40 = vadd.f32 %v1349_v10, %v3089_v17 }
 0x16b   : > { %1750 = vmatpush.bf16.msra.mxu2 %v1670_v54  ;;  %1763 = vmatpush.bf16.msra.mxu3 %v1671_v55  ;;  %v1593_v50 = vmax.f32 %v1331_v39, 0.0  ;;  %v1594_v15 = vmax.f32 %v1350_v40, 0.0 }
 0x16c   : > { %v1297_v58 = vpop.f32.mrf.mxu0  ;;  %v1316_v60 = vpop.f32.mrf.mxu1 }
 0x16d   : > { %v1298_v63 = vadd.f32 %v1297_v58, %v3069_v59  ;;  %v1317_v0 = vadd.f32 %v1316_v60, %v3069_v59 }
 0x16e   : > { %2549 = vmatmul.msk.bf16.vlgmr.msra.gmra.mxu2 %vm1200_vm2, %v3098_v34  ;;  %2550 = vmatmul.msk.bf16.vlgmr.msra.gmra.mxu3 %vm1200_vm2, %v3098_v34 }
 0x16f   : > { %v1631_v6 = vmax.f32 %v1298_v63, 0.0  ;;  %v1632_v7 = vmax.f32 %v1317_v0, 0.0 }
 0x170   : > { %v1332_v61 = vpop.f32.mrf.mxu2  ;;  %v1351_v62 = vpop.f32.mrf.mxu3 }
 0x171   : > { %v1333_v33 = vadd.f32 %v1332_v61, %v3079_v57  ;;  %v1352_v36 = vadd.f32 %v1351_v62, %v3079_v57 }
 0x173   : > { %v1613_v46 = vmax.f32 %v1333_v33, 0.0  ;;  %v1614_v47 = vmax.f32 %v1352_v36, 0.0 }
 0x174   : > { %v1299_v3 = vpop.f32.mrf.mxu0  ;;  %v1318_v5 = vpop.f32.mrf.mxu1 }
 0x175   : > { %v1300_v8 = vadd.f32 %v1299_v3, %v3077_v4  ;;  %v1319_v11 = vadd.f32 %v1318_v5, %v3077_v4  ;;  %v1674_v53 = vpack.c.bf16 %v1613_v46, %v1593_v50  ;;  %v1675_v35 = vpack.c.bf16 %v1614_v47, %v1594_v15 }
 0x177   : > { %v1651_v16 = vmax.f32 %v1300_v8, 0.0  ;;  %v1652_v18 = vmax.f32 %v1319_v11, 0.0 }
 0x178   : > { %v1335_v19 = vpop.f32.mrf.mxu2  ;;  %v1354_v20 = vpop.f32.mrf.mxu3 }
 0x179   : > { %v1692_v23 = vpack.c.bf16 %v1651_v16, %v1631_v6  ;;  %v1693_v24 = vpack.c.bf16 %v1652_v18, %v1632_v7  ;;  %v1336_v29 = vadd.f32 %v1335_v19, %v3069_v59  ;;  %v1355_v12 = vadd.f32 %v1354_v20, %v3069_v59 }
 0x17b   : > { %1775 = vmatpush.bf16.msrb.mxu0 %v1692_v23  ;;  %1788 = vmatpush.bf16.msrb.mxu1 %v1693_v24  ;;  %v1633_v41 = vmax.f32 %v1336_v29, 0.0  ;;  %v1634_v42 = vmax.f32 %v1355_v12, 0.0 }
 0x17c   : > { %v1368_v26 = vpop.f32.mrf.mxu0  ;;  %v1387_v27 = vpop.f32.mrf.mxu1 }
 0x17d   : > { %v1369_v7 = vadd.f32 %v1368_v26, %v3089_v17  ;;  %v1388_v8 = vadd.f32 %v1387_v27, %v3089_v17 }
 0x17f   : > { %1776 = vmatpush.bf16.msrb.mxu0 %v1672_v28  ;;  %1789 = vmatpush.bf16.msrb.mxu1 %v1673_v30  ;;  %v1595_v22 = vmax.f32 %v1369_v7, 0.0  ;;  %v1596_v23 = vmax.f32 %v1388_v8, 0.0 }
 0x180   : > { %v1337_v31 = vpop.f32.mrf.mxu2  ;;  %v1356_v32 = vpop.f32.mrf.mxu3 }
 0x181   : > { %v1338_v37 = vadd.f32 %v1337_v31, %v3077_v4  ;;  %v1357_v38 = vadd.f32 %v1356_v32, %v3077_v4 }
 0x182   : > { %2551 = vmatmul.msk.bf16.vlgmr.msrb.gmra.mxu0 %vm1200_vm2, %v3098_v34  ;;  %2552 = vmatmul.msk.bf16.vlgmr.msrb.gmra.mxu1 %vm1200_vm2, %v3098_v34 }
 0x183   : > { %v1653_v43 = vmax.f32 %v1338_v37, 0.0  ;;  %v1654_v9 = vmax.f32 %v1357_v38, 0.0 }
 0x184   : > { %v1370_v44 = vpop.f32.mrf.mxu0  ;;  %v1389_v45 = vpop.f32.mrf.mxu1 }
 0x185   : > { %v1694_v48 = vpack.c.bf16 %v1653_v43, %v1633_v41  ;;  %v1695_v49 = vpack.c.bf16 %v1654_v9, %v1634_v42  ;;  %v1371_v62 = vadd.f32 %v1370_v44, %v3079_v57  ;;  %v1390_v63 = vadd.f32 %v1389_v45, %v3079_v57 }
 0x187   : > { %1801 = vmatpush.bf16.msrb.mxu2 %v1694_v48  ;;  %1814 = vmatpush.bf16.msrb.mxu3 %v1695_v49  ;;  %v1615_v18 = vmax.f32 %v1371_v62, 0.0  ;;  %v1616_v19 = vmax.f32 %v1390_v63, 0.0 }
 0x188   : > { %v1406_v51 = vpop.f32.mrf.mxu2  ;;  %v1425_v52 = vpop.f32.mrf.mxu3 }
 0x189   : > { %v1676_v25 = vpack.c.bf16 %v1615_v18, %v1595_v22  ;;  %v1677_v28 = vpack.c.bf16 %v1616_v19, %v1596_v23  ;;  %v1407_v36 = vadd.f32 %v1406_v51, %v3089_v17  ;;  %v1426_v37 = vadd.f32 %v1425_v52, %v3089_v17 }
 0x18b   : > { %1802 = vmatpush.bf16.msrb.mxu2 %v1674_v53  ;;  %1815 = vmatpush.bf16.msrb.mxu3 %v1675_v35  ;;  %v1597_v47 = vmax.f32 %v1407_v36, 0.0  ;;  %v1598_v48 = vmax.f32 %v1426_v37, 0.0 }
 0x18c   : > { %v1373_v10 = vpop.f32.mrf.mxu0  ;;  %v1392_v54 = vpop.f32.mrf.mxu1 }
 0x18d   : > { %v1374_v60 = vadd.f32 %v1373_v10, %v3069_v59  ;;  %v1393_v61 = vadd.f32 %v1392_v54, %v3069_v59 }
 0x18e   : > { %2553 = vmatmul.msk.bf16.vlgmr.msrb.gmra.mxu2 %vm1200_vm2, %v3098_v34  ;;  %2554 = vmatmul.msk.bf16.vlgmr.msrb.gmra.mxu3 %vm1200_vm2, %v3098_v34 }
 0x18f   : > { %v1635_v2 = vmax.f32 %v1374_v60, 0.0  ;;  %v1636_v3 = vmax.f32 %v1393_v61, 0.0 }
 0x190   : > { %v1408_v55 = vpop.f32.mrf.mxu2  ;;  %v1427_v58 = vpop.f32.mrf.mxu3 }
 0x191   : > { %v1409_v12 = vadd.f32 %v1408_v55, %v3079_v57  ;;  %v1428_v31 = vadd.f32 %v1427_v58, %v3079_v57 }
 0x193   : > { %v1617_v9 = vmax.f32 %v1409_v12, 0.0  ;;  %v1618_v44 = vmax.f32 %v1428_v31, 0.0 }
 0x194   : > { %v1375_v0 = vpop.f32.mrf.mxu0  ;;  %v1394_v1 = vpop.f32.mrf.mxu1 }
 0x195   : > { %v1376_v5 = vadd.f32 %v1375_v0, %v3077_v4  ;;  %v1395_v6 = vadd.f32 %v1394_v1, %v3077_v4  ;;  %v1678_v15 = vpack.c.bf16 %v1617_v9, %v1597_v47  ;;  %v1679_v51 = vpack.c.bf16 %v1618_v44, %v1598_v48 }
 0x197   : > { %v1655_v11 = vmax.f32 %v1376_v5, 0.0  ;;  %v1656_v13 = vmax.f32 %v1395_v6, 0.0 }
 0x198   : > { %v1411_v14 = vpop.f32.mrf.mxu2  ;;  %v1430_v16 = vpop.f32.mrf.mxu3 }
 0x199   : > { %v1696_v20 = vpack.c.bf16 %v1655_v11, %v1635_v2  ;;  %v1697_v21 = vpack.c.bf16 %v1656_v13, %v1636_v3  ;;  %v1412_v26 = vadd.f32 %v1411_v14, %v3069_v59  ;;  %v1431_v27 = vadd.f32 %v1430_v16, %v3069_v59 }
 0x19b   : > { %1827 = vmatpush.bf16.msra.mxu0 %v1696_v20  ;;  %1840 = vmatpush.bf16.msra.mxu1 %v1697_v21  ;;  %v1637_v38 = vmax.f32 %v1412_v26, 0.0  ;;  %v1638_v39 = vmax.f32 %v1431_v27, 0.0 }
 0x19c   : > { %v1444_v24 = vpop.f32.mrf.mxu0  ;;  %v1463_v56 = vpop.f32.mrf.mxu1 }
 0x19d   : > { %v1445_v1 = vadd.f32 %v1444_v24, %v3089_v17  ;;  %v1464_v2 = vadd.f32 %v1463_v56, %v3089_v17 }
 0x19f   : > { %1828 = vmatpush.bf16.msra.mxu0 %v1676_v25  ;;  %1841 = vmatpush.bf16.msra.mxu1 %v1677_v28  ;;  %v1599_v19 = vmax.f32 %v1445_v1, 0.0  ;;  %v1600_v20 = vmax.f32 %v1464_v2, 0.0 }
 0x1a0   : > { %v1413_v30 = vpop.f32.mrf.mxu2  ;;  %v1432_v29 = vpop.f32.mrf.mxu3 }
 0x1a1   : > { %v1414_v32 = vadd.f32 %v1413_v30, %v3077_v4  ;;  %v1433_v33 = vadd.f32 %v1432_v29, %v3077_v4 }
 0x1a2   : > { %2555 = vmatmul.msk.bf16.vlgmr.msra.gmra.mxu0 %vm1200_vm2, %v3098_v34  ;;  %2556 = vmatmul.msk.bf16.vlgmr.msra.gmra.mxu1 %vm1200_vm2, %v3098_v34 }
 0x1a3   : > { %v1657_v40 = vmax.f32 %v1414_v32, 0.0  ;;  %v1658_v41 = vmax.f32 %v1433_v33, 0.0 }
 0x1a4   : > { %v1446_v42 = vpop.f32.mrf.mxu0  ;;  %v1465_v43 = vpop.f32.mrf.mxu1 }
 0x1a5   : > { %v1698_v45 = vpack.c.bf16 %v1657_v40, %v1637_v38  ;;  %v1699_v46 = vpack.c.bf16 %v1658_v41, %v1638_v39  ;;  %v1447_v61 = vadd.f32 %v1446_v42, %v3079_v57  ;;  %v1466_v62 = vadd.f32 %v1465_v43, %v3079_v57 }
 0x1a7   : > { %1853 = vmatpush.bf16.msra.mxu2 %v1698_v45  ;;  %1866 = vmatpush.bf16.msra.mxu3 %v1699_v46  ;;  %v1619_v13 = vmax.f32 %v1447_v61, 0.0  ;;  %v1620_v14 = vmax.f32 %v1466_v62, 0.0 }
 0x1a8   : > { %v1482_v49 = vpop.f32.mrf.mxu2  ;;  %v1501_v50 = vpop.f32.mrf.mxu3 }
 0x1a9   : > { %v1680_v23 = vpack.c.bf16 %v1619_v13, %v1599_v19  ;;  %v1681_v24 = vpack.c.bf16 %v1620_v14, %v1600_v20  ;;  %v1483_v31 = vadd.f32 %v1482_v49, %v3089_v17  ;;  %v1502_v32 = vadd.f32 %v1501_v50, %v3089_v17  ;;  %v3194_v20 = vpop.permute.xlu2 %1711 }
 0x1ab   : > { %1854 = vmatpush.bf16.msra.mxu2 %v1678_v15  ;;  %1867 = vmatpush.bf16.msra.mxu3 %v1679_v51  ;;  %v1601_v44 = vmax.f32 %v1483_v31, 0.0  ;;  %v1602_v45 = vmax.f32 %v1502_v32, 0.0 }
 0x1ac   : > { %v1449_v52 = vpop.f32.mrf.mxu0  ;;  %v1468_v53 = vpop.f32.mrf.mxu1 }
 0x1ad   : > { %v1450_v54 = vadd.f32 %v1449_v52, %v3069_v59  ;;  %v1469_v55 = vadd.f32 %v1468_v53, %v3069_v59 }
 0x1ae   : > { %2557 = vmatmul.msk.bf16.vlgmr.msra.gmra.mxu2 %vm1200_vm2, %v3098_v34  ;;  %2558 = vmatmul.msk.bf16.vlgmr.msra.gmra.mxu3 %vm1200_vm2, %v3098_v34 }
 0x1af   : > { %v1639_v3 = vmax.f32 %v1450_v54, 0.0  ;;  %v1640_v5 = vmax.f32 %v1469_v55, 0.0 }
 0x1b0   : > { %v1484_v35 = vpop.f32.mrf.mxu2  ;;  %v1503_v10 = vpop.f32.mrf.mxu3 }
 0x1b1   : > { %v1485_v27 = vadd.f32 %v1484_v35, %v3079_v57  ;;  %v1504_v30 = vadd.f32 %v1503_v10, %v3079_v57 }
 0x1b3   : > { %v1621_v41 = vmax.f32 %v1485_v27, 0.0  ;;  %v1622_v42 = vmax.f32 %v1504_v30, 0.0 }
 0x1b4   : > { %v1451_v58 = vpop.f32.mrf.mxu0  ;;  %v1470_v60 = vpop.f32.mrf.mxu1 }
 0x1b5   : > { %v1452_v63 = vadd.f32 %v1451_v58, %v3077_v4  ;;  %v1471_v0 = vadd.f32 %v1470_v60, %v3077_v4  ;;  %v1682_v48 = vpack.c.bf16 %v1621_v41, %v1601_v44  ;;  %v1683_v49 = vpack.c.bf16 %v1622_v42, %v1602_v45 }
 0x1b7   : > { %v1659_v6 = vmax.f32 %v1452_v63, 0.0  ;;  %v1660_v7 = vmax.f32 %v1471_v0, 0.0 }
 0x1b8   : > { %v1487_v8 = vpop.f32.mrf.mxu2  ;;  %v1506_v11 = vpop.f32.mrf.mxu3 }
 0x1b9   : > { %v1700_v16 = vpack.c.bf16 %v1659_v6, %v1639_v3  ;;  %v1701_v18 = vpack.c.bf16 %v1660_v7, %v1640_v5  ;;  %v1488_v56 = vadd.f32 %v1487_v8, %v3069_v59  ;;  %v1507_v25 = vadd.f32 %v1506_v11, %v3069_v59 }
 0x1bb   : > { %1879 = vmatpush.bf16.msrb.mxu0 %v1700_v16  ;;  %1892 = vmatpush.bf16.msrb.mxu1 %v1701_v18  ;;  %v1641_v33 = vmax.f32 %v1488_v56, 0.0  ;;  %v1642_v36 = vmax.f32 %v1507_v25, 0.0 }
 0x1bc   : > { %v1520_v21 = vpop.f32.mrf.mxu0  ;;  %v1539_v22 = vpop.f32.mrf.mxu1 }
 0x1bd   : > { %v1521_v62 = vadd.f32 %v1520_v21, %v3089_v17  ;;  %v1540_v63 = vadd.f32 %v1539_v22, %v3089_v17 }
 0x1bf   : > { %1880 = vmatpush.bf16.msrb.mxu0 %v1680_v23  ;;  %1893 = vmatpush.bf16.msrb.mxu1 %v1681_v24  ;;  %v1603_v14 = vmax.f32 %v1521_v62, 0.0  ;;  %v1604_v16 = vmax.f32 %v1540_v63, 0.0 }
 0x1c0   : > { %v1489_v28 = vpop.f32.mrf.mxu2  ;;  %v1508_v26 = vpop.f32.mrf.mxu3 }
 0x1c1   : > { %v1490_v29 = vadd.f32 %v1489_v28, %v3077_v4  ;;  %v1509_v12 = vadd.f32 %v1508_v26, %v3077_v4 }
 0x1c2   : > { %2559 = vmatmul.msk.bf16.vlgmr.msrb.gmra.mxu0 %vm1200_vm2, %v3098_v34  ;;  %2560 = vmatmul.msk.bf16.vlgmr.msrb.gmra.mxu1 %vm1200_vm2, %v3098_v34 }
 0x1c3   : > { %v1661_v37 = vmax.f32 %v1490_v29, 0.0  ;;  %v1662_v38 = vmax.f32 %v1509_v12, 0.0 }
 0x1c4   : > { %v1522_v39 = vpop.f32.mrf.mxu0  ;;  %v1541_v40 = vpop.f32.mrf.mxu1 }
 0x1c5   : > { %v1702_v43 = vpack.c.bf16 %v1661_v37, %v1641_v33  ;;  %v1703_v9 = vpack.c.bf16 %v1662_v38, %v1642_v36  ;;  %v1523_v55 = vadd.f32 %v1522_v39, %v3079_v57  ;;  %v1542_v58 = vadd.f32 %v1541_v40, %v3079_v57 }
 0x1c7   : > { %1905 = vmatpush.bf16.msrb.mxu2 %v1702_v43  ;;  %1918 = vmatpush.bf16.msrb.mxu3 %v1703_v9  ;;  %v1623_v7 = vmax.f32 %v1523_v55, 0.0  ;;  %v1624_v8 = vmax.f32 %v1542_v58, 0.0 }
 0x1c8   : > { %v1558_v46 = vpop.f32.mrf.mxu2  ;;  %v1577_v47 = vpop.f32.mrf.mxu3 }
 0x1c9   : > { %v1684_v18 = vpack.c.bf16 %v1623_v7, %v1603_v14  ;;  %v1685_v19 = vpack.c.bf16 %v1624_v8, %v1604_v16  ;;  %v1559_v12 = vadd.f32 %v1558_v46, %v3089_v17  ;;  %v1578_v31 = vadd.f32 %v1577_v47, %v3089_v17 }
 0x1cb   : > { %1906 = vmatpush.bf16.msrb.mxu2 %v1682_v48  ;;  %1919 = vmatpush.bf16.msrb.mxu3 %v1683_v49  ;;  %v1605_v40 = vmax.f32 %v1559_v12, 0.0  ;;  %v1606_v17 = vmax.f32 %v1578_v31, 0.0 }
 0x1cc   : > { %v1525_v50 = vpop.f32.mrf.mxu0  ;;  %v1544_v15 = vpop.f32.mrf.mxu1 }
 0x1cd   : > { %v1526_v53 = vadd.f32 %v1525_v50, %v3069_v59  ;;  %v1545_v35 = vadd.f32 %v1544_v15, %v3069_v59 }
 0x1ce   : > { %2561 = vmatmul.msk.bf16.vlgmr.msrb.gmra.mxu2 %vm1200_vm2, %v3098_v34  ;;  %2562 = vmatmul.msk.bf16.vlgmr.msrb.gmra.mxu3 %vm1200_vm2, %v3098_v34 }
 0x1cf   : > { %v1643_v0 = vmax.f32 %v1526_v53, 0.0  ;;  %v1644_v1 = vmax.f32 %v1545_v35, 0.0 }
 0x1d0   : > { %v1560_v51 = vpop.f32.mrf.mxu2  ;;  %v1579_v52 = vpop.f32.mrf.mxu3 }
 0x1d1   : > { %v1580_v27 = vadd.f32 %v1579_v52, %v3079_v57 }
 0x1d4   : > { %v1527_v10 = vpop.f32.mrf.mxu0  ;;  %v1546_v54 = vpop.f32.mrf.mxu1 }
 0x1d5   : > { %v1528_v60 = vadd.f32 %v1527_v10, %v3077_v4  ;;  %v1547_v61 = vadd.f32 %v1546_v54, %v3077_v4 }
 0x1d7   : > { %v1663_v2 = vmax.f32 %v1528_v60, 0.0  ;;  %v1664_v3 = vmax.f32 %v1547_v61, 0.0 }
 0x1d8   : > { %v1563_v5 = vpop.f32.mrf.mxu2  ;;  %v1582_v6 = vpop.f32.mrf.mxu3 }
 0x1d9   : > { %v1704_v11 = vpack.c.bf16 %v1663_v2, %v1643_v0  ;;  %v1705_v13 = vpack.c.bf16 %v1664_v3, %v1644_v1  ;;  %v1564_v21 = vadd.f32 %v1563_v5, %v3069_v59  ;;  %v1583_v22 = vadd.f32 %v1582_v6, %v3069_v59 }
 0x1da   : > { %v1561_v59 = vadd.f32 %v1560_v51, %v3079_v57 }
 0x1db   : > { %1931 = vmatpush.bf16.msra.mxu0 %v1704_v11  ;;  %1944 = vmatpush.bf16.msra.mxu1 %v1705_v13  ;;  %v1645_v32 = vmax.f32 %v1564_v21, 0.0  ;;  %v1646_v33 = vmax.f32 %v1583_v22, 0.0 }
 0x1dc   : > { %v1625_v37 = vmax.f32 %v1561_v59, 0.0 }
 0x1de   : > { %v1686_v43 = vpack.c.bf16 %v1625_v37, %v1605_v40 }
 0x1df   : > { %v1726_v23 = vpop.f32.mrf.mxu0  ;;  %v1739_v24 = vpop.f32.mrf.mxu1  ;;  %1932 = vmatpush.bf16.msra.mxu0 %v1684_v18  ;;  %1945 = vmatpush.bf16.msra.mxu1 %v1685_v19 }
 0x1e0   : > { %v3205_v56 = vadd.f32 %v1726_v23, %v3194_v20  ;;  %v3208_v25 = vadd.f32 %v1739_v24, %v3194_v20  ;;  %v1565_v28 = vpop.f32.mrf.mxu2  ;;  %v1584_v26 = vpop.f32.mrf.mxu3 }
 0x1e1   : > { %v1566_v30 = vadd.f32 %v1565_v28, %v3077_v4  ;;  %v1585_v29 = vadd.f32 %v1584_v26, %v3077_v4  ;;  %v1626_v4 = vmax.f32 %v1580_v27, 0.0 }
 0x1e2   : > { %1977 = vst [vmem:[%s3202_s13] sm:$0xff] %v3205_v56  ;;  %2563 = vmatmul.msk.bf16.vlgmr.msra.gmra.mxu0 %vm1200_vm2, %v3098_v34  ;;  %2564 = vmatmul.msk.bf16.vlgmr.msra.gmra.mxu1 %vm1200_vm2, %v3098_v34 }
 0x1e3   : > { %1978 = vst [vmem:[%s3202_s13 + $0x8] sm:$0xff] %v3208_v25  ;;  %v1665_v57 = vmax.f32 %v1566_v30, 0.0  ;;  %v1666_v36 = vmax.f32 %v1585_v29, 0.0  ;;  %v1687_v9 = vpack.c.bf16 %v1626_v4, %v1606_v17 }
 0x1e5   : > { %v1706_v38 = vpack.c.bf16 %v1665_v57, %v1645_v32  ;;  %v1707_v39 = vpack.c.bf16 %v1666_v36, %v1646_v33 }
 0x1e7   : > { %1957 = vmatpush.bf16.msra.mxu2 %v1706_v38  ;;  %1970 = vmatpush.bf16.msra.mxu3 %v1707_v39  ;;  %v1728_v41 = vpop.f32.mrf.mxu0  ;;  %v1741_v42 = vpop.f32.mrf.mxu1 }
 0x1eb   : > { %1958 = vmatpush.bf16.msra.mxu2 %v1686_v43  ;;  %1971 = vmatpush.bf16.msra.mxu3 %v1687_v9 }
 0x1ee   : > { %2565 = vmatmul.msk.bf16.vlgmr.msra.gmra.mxu2 %vm1200_vm2, %v3098_v34  ;;  %2566 = vmatmul.msk.bf16.vlgmr.msra.gmra.mxu3 %vm1200_vm2, %v3098_v34 }
 0x1f1   : > { %v1752_v44 = vpop.f32.mrf.mxu2  ;;  %v1765_v45 = vpop.f32.mrf.mxu3 }
 0x1f2   : > { %v3229_v46 = vadd.f32 %v1752_v44, %v3194_v20  ;;  %v3232_v47 = vadd.f32 %v1765_v45, %v3194_v20 }
 0x1f4   : > { %1979 = vst [vmem:[%s3202_s13 + $0x10] sm:$0xff] %v3229_v46 }
 0x1f5   : > { %1980 = vst [vmem:[%s3202_s13 + $0x18] sm:$0xff] %v3232_v47 }
 0x1f9   : > { %v1754_v48 = vpop.f32.mrf.mxu2  ;;  %v1767_v49 = vpop.f32.mrf.mxu3 }
 0x1ff   : > { %v1778_v50 = vpop.f32.mrf.mxu0  ;;  %v1791_v15 = vpop.f32.mrf.mxu1 }
 0x200   : > { %v3239_v34 = vadd.f32 %v1778_v50, %v3194_v20  ;;  %v3242_v51 = vadd.f32 %v1791_v15, %v3194_v20 }
 0x202   : > { %1981 = vst [vmem:[%s3202_s13 + $0x20] sm:$0xff] %v3239_v34 }
 0x203   : > { %1982 = vst [vmem:[%s3202_s13 + $0x28] sm:$0xff] %v3242_v51 }
 0x207   : > { %v1780_v52 = vpop.f32.mrf.mxu0  ;;  %v1793_v53 = vpop.f32.mrf.mxu1 }
 0x211   : > { %v1804_v35 = vpop.f32.mrf.mxu2  ;;  %v1817_v10 = vpop.f32.mrf.mxu3 }
 0x212   : > { %v3249_v54 = vadd.f32 %v1804_v35, %v3194_v20  ;;  %v3252_v55 = vadd.f32 %v1817_v10, %v3194_v20 }
 0x214   : > { %1983 = vst [vmem:[%s3202_s13 + $0x30] sm:$0xff] %v3249_v54 }
 0x215   : > { %1984 = vst [vmem:[%s3202_s13 + $0x38] sm:$0xff] %v3252_v55 }
 0x219   : > { %v1806_v58 = vpop.f32.mrf.mxu2  ;;  %v1819_v60 = vpop.f32.mrf.mxu3 }
 0x21f   : > { %v1830_v61 = vpop.f32.mrf.mxu0  ;;  %v1843_v62 = vpop.f32.mrf.mxu1 }
 0x220   : > { %v3259_v63 = vadd.f32 %v1830_v61, %v3194_v20  ;;  %v3262_v0 = vadd.f32 %v1843_v62, %v3194_v20 }
 0x222   : > { %1985 = vst [vmem:[%s3202_s13 + $0x40] sm:$0xff] %v3259_v63 }
 0x223   : > { %1986 = vst [vmem:[%s3202_s13 + $0x48] sm:$0xff] %v3262_v0 }
 0x227   : > { %v1832_v1 = vpop.f32.mrf.mxu0  ;;  %v1845_v2 = vpop.f32.mrf.mxu1 }
 0x231   : > { %v1856_v3 = vpop.f32.mrf.mxu2  ;;  %v1869_v5 = vpop.f32.mrf.mxu3 }
 0x232   : > { %v3269_v6 = vadd.f32 %v1856_v3, %v3194_v20  ;;  %v3272_v7 = vadd.f32 %v1869_v5, %v3194_v20 }
 0x234   : > { %1987 = vst [vmem:[%s3202_s13 + $0x50] sm:$0xff] %v3269_v6 }
 0x235   : > { %1988 = vst [vmem:[%s3202_s13 + $0x58] sm:$0xff] %v3272_v7 }
 0x239   : > { %v1858_v8 = vpop.f32.mrf.mxu2  ;;  %v1871_v11 = vpop.f32.mrf.mxu3 }
 0x23f   : > { %v1882_v13 = vpop.f32.mrf.mxu0  ;;  %v1895_v14 = vpop.f32.mrf.mxu1 }
 0x240   : > { %v3279_v16 = vadd.f32 %v1882_v13, %v3194_v20  ;;  %v3282_v18 = vadd.f32 %v1895_v14, %v3194_v20 }
 0x242   : > { %1989 = vst [vmem:[%s3202_s13 + $0x60] sm:$0xff] %v3279_v16 }
 0x243   : > { %1990 = vst [vmem:[%s3202_s13 + $0x68] sm:$0xff] %v3282_v18 }
 0x247   : > { %v1884_v19 = vpop.f32.mrf.mxu0  ;;  %v1897_v21 = vpop.f32.mrf.mxu1 }
 0x251   : > { %v1908_v22 = vpop.f32.mrf.mxu2  ;;  %v1921_v23 = vpop.f32.mrf.mxu3 }
 0x252   : > { %v3289_v24 = vadd.f32 %v1908_v22, %v3194_v20  ;;  %v3292_v28 = vadd.f32 %v1921_v23, %v3194_v20 }
 0x254   : > { %1991 = vst [vmem:[%s3202_s13 + $0x70] sm:$0xff] %v3289_v24 }
 0x255   : > { %1992 = vst [vmem:[%s3202_s13 + $0x78] sm:$0xff] %v3292_v28 }
 0x259   : > { %v1910_v26 = vpop.f32.mrf.mxu2  ;;  %v1923_v59 = vpop.f32.mrf.mxu3 }
 0x25f   : > { %v1934_v27 = vpop.f32.mrf.mxu0  ;;  %v1947_v30 = vpop.f32.mrf.mxu1 }
 0x260   : > { %v3299_v29 = vadd.f32 %v1934_v27, %v3194_v20  ;;  %v3302_v12 = vadd.f32 %v1947_v30, %v3194_v20 }
 0x262   : > { %1993 = vst [vmem:[%s3202_s13 + $0x80] sm:$0xff] %v3299_v29 }
 0x263   : > { %1994 = vst [vmem:[%s3202_s13 + $0x88] sm:$0xff] %v3302_v12 }
 0x267   : > { %v1936_v31 = vpop.f32.mrf.mxu0  ;;  %v1949_v32 = vpop.f32.mrf.mxu1 }
 0x271   : > { %v1960_v33 = vpop.f32.mrf.mxu2  ;;  %v1973_v57 = vpop.f32.mrf.mxu3 }
 0x272   : > { %v3309_v36 = vadd.f32 %v1960_v33, %v3194_v20  ;;  %v3312_v37 = vadd.f32 %v1973_v57, %v3194_v20 }
 0x274   : > { %1995 = vst [vmem:[%s3202_s13 + $0x90] sm:$0xff] %v3309_v36 }
 0x275   : > { %1996 = vst [vmem:[%s3202_s13 + $0x98] sm:$0xff] %v3312_v37  ;;  %2000 = sbr.rel (%p2567_p5) target bundleno = 949 (0x3b5), region = 60 }
 0x279   : > { %v1962_v4 = vpop.f32.mrf.mxu2  ;;  %v1975_v38 = vpop.f32.mrf.mxu3 }
 0x27a   : > { %v2102_v39 = vadd.f32 %v3208_v25, %v3205_v56  ;;  %v2001_v9 = vlaneseq  ;;  %v2598_v58 = vmov 0.0   ;;  %vm2164_vm4 = vcmask 7168  }
 0x27c   : > { %v2103_v40 = vadd.f32 %v2102_v39, %v3229_v46  ;;  %v2002_v48 = vand.u32 127, %v2001_v9 }
 0x27e   : > { %v2104_v17 = vadd.f32 %v2103_v40, %v3232_v47  ;;  %v2021_v15 = vadd.s32 2432, %v2002_v48 }
 0x280   : > { %v2105_v41 = vadd.f32 %v2104_v17, %v3239_v34  ;;  %vm2041_vm3 = vcmp.lt.s32.totalorder %v2021_v15, 2440 }
 0x281   : > { %v3335_v60 = vsel %vm2041_vm3, 1.0, %v2598_v58 }
 0x282   : > { %v2106_v20 = vadd.f32 %v2105_v41, %v3242_v51  ;;  %v2101_v62 = vmul.f32 %v3335_v60, %v3312_v37 }
 0x284   : > { %v2107_v42 = vadd.f32 %v2106_v20, %v3249_v54 }
 0x286   : > { %v2108_v43 = vadd.f32 %v2107_v42, %v3252_v55 }
 0x288   : > { %v2109_v44 = vadd.f32 %v2108_v43, %v3259_v63 }
 0x28a   : > { %v2110_v45 = vadd.f32 %v2109_v44, %v3262_v0 }
 0x28c   : > { %v2111_v49 = vadd.f32 %v2110_v45, %v3269_v6 }
 0x28e   : > { %v2112_v50 = vadd.f32 %v2111_v49, %v3272_v7 }
 0x290   : > { %v2113_v52 = vadd.f32 %v2112_v50, %v3279_v16 }
 0x292   : > { %v2114_v53 = vadd.f32 %v2113_v52, %v3282_v18 }
 0x294   : > { %v2115_v35 = vadd.f32 %v2114_v53, %v3289_v24 }
 0x296   : > { %v2116_v10 = vadd.f32 %v2115_v35, %v3292_v28 }
 0x298   : > { %v2117_v61 = vadd.f32 %v2116_v10, %v3299_v29 }
 0x29a   : > { %v2118_v1 = vadd.f32 %v2117_v61, %v3302_v12 }
 0x29c   : > { %v2119_v2 = vadd.f32 %v2118_v1, %v3309_v36 }
 0x29e   : > { %v2120_v3 = vadd.f32 %v2119_v2, %v2101_v62 }
 0x2a0   : > { %2121 = vadd.xlane.f32.xlu0 %v2120_v3 }
 0x313   : > { %v2122_v5 = vpop.xlane.xlu0 %2121 }
 0x314   : > { %v2123_v8 = vmul.f32 0.00040983607, %v2122_v5  ;;  %2165 = vst.msk [vmem:[%s2683_s29] sm:$0xff] %vm2164_vm4, %v2122_v5 }
 0x316   : > { %v2124_v11 = vsub.f32 %v3205_v56, %v2123_v8  ;;  %v2125_v13 = vsub.f32 %v3208_v25, %v2123_v8  ;;  %v2126_v14 = vsub.f32 %v3229_v46, %v2123_v8  ;;  %v2127_v22 = vsub.f32 %v3232_v47, %v2123_v8 }
 0x317   : > { %v2128_v23 = vsub.f32 %v3239_v34, %v2123_v8  ;;  %v2129_v27 = vsub.f32 %v3242_v51, %v2123_v8  ;;  %v2130_v32 = vsub.f32 %v3249_v54, %v2123_v8  ;;  %v2131_v4 = vsub.f32 %v3252_v55, %v2123_v8 }
 0x318   : > { %v2166_v19 = vmul.f32 %v2124_v11, %v2124_v11  ;;  %v2167_v21 = vmul.f32 %v2125_v13, %v2125_v13  ;;  %v2168_v26 = vmul.f32 %v2126_v14, %v2126_v14  ;;  %v2169_v30 = vmul.f32 %v2127_v22, %v2127_v22 }
 0x319   : > { %v2170_v33 = vmul.f32 %v2128_v23, %v2128_v23  ;;  %v2171_v38 = vmul.f32 %v2129_v27, %v2129_v27  ;;  %v2132_v40 = vsub.f32 %v3259_v63, %v2123_v8  ;;  %v2172_v17 = vmul.f32 %v2130_v32, %v2130_v32 }
 0x31a   : > { %v2186_v59 = vadd.f32 %v2167_v21, %v2166_v19  ;;  %v2133_v20 = vsub.f32 %v3262_v0, %v2123_v8  ;;  %v2173_v42 = vmul.f32 %v2131_v4, %v2131_v4  ;;  %v2134_v9 = vsub.f32 %v3269_v6, %v2123_v8 }
 0x31b   : > { %v2174_v44 = vmul.f32 %v2132_v40, %v2132_v40  ;;  %v2135_v48 = vsub.f32 %v3272_v7, %v2123_v8  ;;  %v2136_v15 = vsub.f32 %v3279_v16, %v2123_v8  ;;  %v2137_v35 = vsub.f32 %v3282_v18, %v2123_v8 }
 0x31c   : > { %v2187_v31 = vadd.f32 %v2186_v59, %v2168_v26  ;;  %v2175_v49 = vmul.f32 %v2133_v20, %v2133_v20  ;;  %v2176_v52 = vmul.f32 %v2134_v9, %v2134_v9  ;;  %v2138_v61 = vsub.f32 %v3289_v24, %v2123_v8 }
 0x31d   : > { %v2177_v10 = vmul.f32 %v2135_v48, %v2135_v48  ;;  %v2178_v62 = vmul.f32 %v2136_v15, %v2136_v15  ;;  %v2139_v2 = vsub.f32 %v3292_v28, %v2123_v8  ;;  %v2179_v3 = vmul.f32 %v2137_v35, %v2137_v35 }
 0x31e   : > { %v2188_v57 = vadd.f32 %v2187_v31, %v2169_v30  ;;  %v2140_v11 = vsub.f32 %v3299_v29, %v2123_v8  ;;  %v2180_v13 = vmul.f32 %v2138_v61, %v2138_v61  ;;  %v2141_v19 = vsub.f32 %v3302_v12, %v2123_v8 }
 0x31f   : > { %v2143_v21 = vsub.f32 %v3312_v37, %v2123_v8  ;;  %v2181_v22 = vmul.f32 %v2139_v2, %v2139_v2  ;;  %v2142_v26 = vsub.f32 %v3309_v36, %v2123_v8 }
 0x320   : > { %v2189_v39 = vadd.f32 %v2188_v57, %v2170_v33  ;;  %v2182_v59 = vmul.f32 %v2140_v11, %v2140_v11  ;;  %v2183_v31 = vmul.f32 %v2141_v19, %v2141_v19 }
 0x321   : > { %v2163_v30 = vmul.f32 %v3335_v60, %v2143_v21  ;;  %v2184_v33 = vmul.f32 %v2142_v26, %v2142_v26 }
 0x322   : > { %v2190_v41 = vadd.f32 %v2189_v39, %v2171_v38 }
 0x323   : > { %v2185_v4 = vmul.f32 %v2163_v30, %v2163_v30 }
 0x324   : > { %v2191_v43 = vadd.f32 %v2190_v41, %v2172_v17 }
 0x326   : > { %v2192_v45 = vadd.f32 %v2191_v43, %v2173_v42 }
 0x328   : > { %v2193_v50 = vadd.f32 %v2192_v45, %v2174_v44 }
 0x32a   : > { %v2194_v53 = vadd.f32 %v2193_v50, %v2175_v49 }
 0x32c   : > { %v2195_v58 = vadd.f32 %v2194_v53, %v2176_v52 }
 0x32e   : > { %v2196_v1 = vadd.f32 %v2195_v58, %v2177_v10 }
 0x330   : > { %v2197_v5 = vadd.f32 %v2196_v1, %v2178_v62 }
 0x332   : > { %v2198_v14 = vadd.f32 %v2197_v5, %v2179_v3 }
 0x334   : > { %v2199_v23 = vadd.f32 %v2198_v14, %v2180_v13 }
 0x336   : > { %v2200_v27 = vadd.f32 %v2199_v23, %v2181_v22 }
 0x338   : > { %v2201_v32 = vadd.f32 %v2200_v27, %v2182_v59 }
 0x33a   : > { %v2202_v57 = vadd.f32 %v2201_v32, %v2183_v31 }
 0x33c   : > { %v2203_v38 = vadd.f32 %v2202_v57, %v2184_v33 }
 0x33e   : > { %v2204_v39 = vadd.f32 %v2203_v38, %v2185_v4 }
 0x340   : > { %2205 = vadd.xlane.f32.xlu0 %v2204_v39 }
 0x3b3   : > { %v2206_v40 = vpop.xlane.xlu0 %2205 }
 0x3b4   : > { %2207 = vst.msk [vmem:[%s2694_s16] sm:$0xff] %vm2164_vm4, %v2206_v40 }
 0x3b5 PF: > { %p2569_p6 = scmp.eq.s32.totalorder %s2665_s18, 1 }
 0x3b7   : > { %2211 = sbr.rel (%p2569_p6) target bundleno = 1271 (0x4f7), region = 64 }
 0x3bc   : > { %v2212_v8 = vadd.f32 %v3208_v25, %v3205_v56  ;;  %vm2254_vm5 = vcmask 7168  }
 0x3be   : > { %v2213_v60 = vadd.f32 %v2212_v8, %v3229_v46 }
 0x3c0   : > { %v2214_v17 = vadd.f32 %v2213_v60, %v3232_v47 }
 0x3c2   : > { %v2215_v41 = vadd.f32 %v2214_v17, %v3239_v34 }
 0x3c4   : > { %v2216_v20 = vadd.f32 %v2215_v41, %v3242_v51 }
 0x3c6   : > { %v2217_v42 = vadd.f32 %v2216_v20, %v3249_v54 }
 0x3c8   : > { %v2218_v43 = vadd.f32 %v2217_v42, %v3252_v55 }
 0x3ca   : > { %v2219_v9 = vadd.f32 %v2218_v43, %v3259_v63 }
 0x3cc   : > { %v2220_v44 = vadd.f32 %v2219_v9, %v3262_v0 }
 0x3ce   : > { %v2221_v45 = vadd.f32 %v2220_v44, %v3269_v6 }
 0x3d0   : > { %v2222_v48 = vadd.f32 %v2221_v45, %v3272_v7 }
 0x3d2   : > { %v2223_v49 = vadd.f32 %v2222_v48, %v3279_v16 }
 0x3d4   : > { %v2224_v50 = vadd.f32 %v2223_v49, %v3282_v18 }
 0x3d6   : > { %v2225_v15 = vadd.f32 %v2224_v50, %v3289_v24 }
 0x3d8   : > { %v2226_v52 = vadd.f32 %v2225_v15, %v3292_v28 }
 0x3da   : > { %v2227_v53 = vadd.f32 %v2226_v52, %v3299_v29 }
 0x3dc   : > { %v2228_v35 = vadd.f32 %v2227_v53, %v3302_v12 }
 0x3de   : > { %v2229_v10 = vadd.f32 %v2228_v35, %v3309_v36 }
 0x3e0   : > { %v2230_v58 = vadd.f32 %v2229_v10, %v3312_v37 }
 0x3e2   : > { %2231 = vadd.xlane.f32.xlu0 %v2230_v58 }
 0x455   : > { %v2232_v61 = vpop.xlane.xlu0 %2231 }
 0x456   : > { %v2233_v62 = vmul.f32 0.000390625, %v2232_v61  ;;  %2255 = vst.msk [vmem:[%s2683_s29] sm:$0xff] %vm2254_vm5, %v2232_v61 }
 0x458   : > { %v2234_v1 = vsub.f32 %v3205_v56, %v2233_v62  ;;  %v2235_v2 = vsub.f32 %v3208_v25, %v2233_v62  ;;  %v2236_v3 = vsub.f32 %v3229_v46, %v2233_v62  ;;  %v2237_v13 = vsub.f32 %v3232_v47, %v2233_v62 }
 0x459   : > { %v2238_v14 = vsub.f32 %v3239_v34, %v2233_v62  ;;  %v2239_v22 = vsub.f32 %v3242_v51, %v2233_v62  ;;  %v2240_v59 = vsub.f32 %v3249_v54, %v2233_v62  ;;  %v2241_v25 = vsub.f32 %v3252_v55, %v2233_v62 }
 0x45a   : > { %v2256_v5 = vmul.f32 %v2234_v1, %v2234_v1  ;;  %v2257_v11 = vmul.f32 %v2235_v2, %v2235_v2  ;;  %v2258_v19 = vmul.f32 %v2236_v3, %v2236_v3  ;;  %v2259_v23 = vmul.f32 %v2237_v13, %v2237_v13 }
 0x45b   : > { %v2260_v27 = vmul.f32 %v2238_v14, %v2238_v14  ;;  %v2261_v30 = vmul.f32 %v2239_v22, %v2239_v22  ;;  %v2242_v31 = vsub.f32 %v3259_v63, %v2233_v62  ;;  %v2262_v32 = vmul.f32 %v2240_v59, %v2240_v59 }
 0x45c   : > { %v2276_v21 = vadd.f32 %v2257_v11, %v2256_v5  ;;  %v2243_v34 = vsub.f32 %v3262_v0, %v2233_v62  ;;  %v2263_v33 = vmul.f32 %v2241_v25, %v2241_v25  ;;  %v2244_v51 = vsub.f32 %v3269_v6, %v2233_v62 }
 0x45d   : > { %v2264_v4 = vmul.f32 %v2242_v31, %v2242_v31  ;;  %v2245_v54 = vsub.f32 %v3272_v7, %v2233_v62  ;;  %v2246_v55 = vsub.f32 %v3279_v16, %v2233_v62  ;;  %v2247_v63 = vsub.f32 %v3282_v18, %v2233_v62 }
 0x45e   : > { %v2277_v26 = vadd.f32 %v2276_v21, %v2258_v19  ;;  %v2265_v39 = vmul.f32 %v2243_v34, %v2243_v34  ;;  %v2266_v8 = vmul.f32 %v2244_v51, %v2244_v51  ;;  %v2248_v0 = vsub.f32 %v3289_v24, %v2233_v62 }
 0x45f   : > { %v2267_v17 = vmul.f32 %v2245_v54, %v2245_v54  ;;  %v2268_v20 = vmul.f32 %v2246_v55, %v2246_v55  ;;  %v2249_v6 = vsub.f32 %v3292_v28, %v2233_v62  ;;  %v2269_v43 = vmul.f32 %v2247_v63, %v2247_v63 }
 0x460   : > { %v2278_v56 = vadd.f32 %v2277_v26, %v2259_v23  ;;  %v2250_v7 = vsub.f32 %v3299_v29, %v2233_v62  ;;  %v2270_v44 = vmul.f32 %v2248_v0, %v2248_v0  ;;  %v2251_v16 = vsub.f32 %v3302_v12, %v2233_v62 }
 0x461   : > { %v2271_v48 = vmul.f32 %v2249_v6, %v2249_v6  ;;  %v2252_v18 = vsub.f32 %v3309_v36, %v2233_v62  ;;  %v2253_v24 = vsub.f32 %v3312_v37, %v2233_v62 }
 0x462   : > { %v2279_v46 = vadd.f32 %v2278_v56, %v2260_v27  ;;  %v2272_v50 = vmul.f32 %v2250_v7, %v2250_v7  ;;  %v2273_v52 = vmul.f32 %v2251_v16, %v2251_v16 }
 0x463   : > { %v2274_v28 = vmul.f32 %v2252_v18, %v2252_v18  ;;  %v2275_v10 = vmul.f32 %v2253_v24, %v2253_v24 }
 0x464   : > { %v2280_v47 = vadd.f32 %v2279_v46, %v2261_v30 }
 0x466   : > { %v2281_v57 = vadd.f32 %v2280_v47, %v2262_v32 }
 0x468   : > { %v2282_v38 = vadd.f32 %v2281_v57, %v2263_v33 }
 0x46a   : > { %v2283_v40 = vadd.f32 %v2282_v38, %v2264_v4 }
 0x46c   : > { %v2284_v60 = vadd.f32 %v2283_v40, %v2265_v39 }
 0x46e   : > { %v2285_v41 = vadd.f32 %v2284_v60, %v2266_v8 }
 0x470   : > { %v2286_v42 = vadd.f32 %v2285_v41, %v2267_v17 }
 0x472   : > { %v2287_v9 = vadd.f32 %v2286_v42, %v2268_v20 }
 0x474   : > { %v2288_v45 = vadd.f32 %v2287_v9, %v2269_v43 }
 0x476   : > { %v2289_v49 = vadd.f32 %v2288_v45, %v2270_v44 }
 0x478   : > { %v2290_v15 = vadd.f32 %v2289_v49, %v2271_v48 }
 0x47a   : > { %v2291_v53 = vadd.f32 %v2290_v15, %v2272_v50 }
 0x47c   : > { %v2292_v35 = vadd.f32 %v2291_v53, %v2273_v52 }
 0x47e   : > { %v2293_v58 = vadd.f32 %v2292_v35, %v2274_v28 }
 0x480   : > { %v2294_v29 = vadd.f32 %v2293_v58, %v2275_v10 }
 0x482   : > { %2295 = vadd.xlane.f32.xlu0 %v2294_v29 }
 0x4f5   : > { %v2296_v61 = vpop.xlane.xlu0 %2295 }
 0x4f6   : > { %2297 = vst.msk [vmem:[%s2694_s16] sm:$0xff] %vm2254_vm5, %v2296_v61 }
 0x4f7 PF: > { %s22_s17 = sadd.s32 1, %s2595_s17  }
 0x4f8   : > { %p19_p7 = scmp.ge.s32.totalorder %s22_s17, 4  }
 0x4fa   :  { %21 = sbr.rel (!%p19_p7) target bundleno = 1 (0x1), region = 124 }

</bundles_post_ra>
